<compile_context>
chip_gen: v7x
topology: tpu7x:2x2x1
jax: 0.10.0
libtpu: 0.0.40
codegen_flags: <defaults>
</compile_context>

<pallas_src>
import functools

import jax
import jax.numpy as jnp
from jax.experimental import pallas as pl
from jax.experimental.pallas import tpu as pltpu

# ---------------- config (small synthetic BERT) ----------------
VOCAB = 100
MAX_POS = 16
TYPE_VOCAB = 2
HIDDEN = 32
NUM_HEADS = 2
HEAD_DIM = HIDDEN // NUM_HEADS
FFN = 4 * HIDDEN
NUM_LAYERS = 2
NUM_OUTPUTS = 4
LN_EPS = 1e-12  # BERT default

EMB_ROWS = VOCAB + MAX_POS + TYPE_VOCAB        # combined embedding table rows
VEC_W = max(FFN, 3 * HIDDEN)                   # 128: lane width of the bias/LN slab
ROWS_PER_LAYER = 8                             # b_qkv, b_o, ln1_g, ln1_b, b1, b2, ln2_g, ln2_b
REG_B_ROW = 2 + ROWS_PER_LAYER * NUM_LAYERS    # after emb_ln_g/emb_ln_b + layer rows
VEC_ROWS = REG_B_ROW + 1


def _layernorm(x, gamma, beta, eps=LN_EPS):
    mu = jnp.mean(x, axis=-1, keepdims=True)
    var = jnp.mean((x - mu) ** 2, axis=-1, keepdims=True)
    return (x - mu) * jax.lax.rsqrt(var + eps) * gamma + beta


# ---------------- single fused kernel: whole forward pass ----------------
def fused_forward_kernel(ids_ref, mask_ref, emb_ref, vec_ref,
                         attn_w_ref, ffn_w1_ref, ffn_w2_ref, reg_w_ref,
                         o_ref, *, B, S):
    BS = B * S

    def vrow(r, w):
        # Static slice of the packed (VEC_ROWS, 128) bias/LN slab -> (1, w).
        return vec_ref[r:r + 1, 0:w]

    # --- prologue: fused embedding gather (one-hot MXU matmul) + LayerNorm ---
    lane = jax.lax.broadcasted_iota(jnp.int32, (BS, EMB_ROWS), 1)
    ids = ids_ref[...]                                            # (BS, 1) int32
    row_iota = jax.lax.broadcasted_iota(jnp.int32, (BS, 1), 0)
    if S & (S - 1) == 0:                                          # static: power of two
        pos = row_iota & (S - 1)
    else:
        pos = row_iota % S
    # Each row has exactly 3 ones (word id, position, token-type 0) in disjoint
    # lane ranges, so a single matmul computes word+pos+type embedding sum.
    sel = (lane == ids) | (lane == VOCAB + pos) | (lane == VOCAB + MAX_POS)
    onehot = jnp.where(sel, 1.0, 0.0).astype(jnp.float32)          # (BS, EMB_ROWS)
    x = jnp.dot(onehot, emb_ref[...], preferred_element_type=jnp.float32)  # (BS, H)
    x = _layernorm(x, vrow(0, HIDDEN), vrow(1, HIDDEN))

    # Additive key bias from the attention mask (hoisted; broadcast once).
    key_bias = jnp.where(mask_ref[...] == 0, -1e9, 0.0).astype(jnp.float32)  # (B, S)
    bias3 = jnp.broadcast_to(key_bias[:, None, :], (B, S, S))

    scale = 1.0 / (HEAD_DIM ** 0.5)

    # --- encoder layers (all weights resident in VMEM, batch flattened) ---
    for l in range(NUM_LAYERS):
        base = 2 + l * ROWS_PER_LAYER
        aw = attn_w_ref[l]                          # (H, 4H) bf16: [wq|wk|wv|wo]
        w_qkv = aw[:, 0:3 * HIDDEN]
        w_o = aw[:, 3 * HIDDEN:4 * HIDDEN]
        w1 = ffn_w1_ref[l]                          # (H, FFN) bf16
        w2 = ffn_w2_ref[l]                          # (FFN, H) bf16
        b_qkv = vrow(base + 0, 3 * HIDDEN)
        b_o = vrow(base + 1, HIDDEN)
        ln1_g, ln1_b = vrow(base + 2, HIDDEN), vrow(base + 3, HIDDEN)
        b1 = vrow(base + 4, FFN)
        b2 = vrow(base + 5, HIDDEN)
        ln2_g, ln2_b = vrow(base + 6, HIDDEN), vrow(base + 7, HIDDEN)

        # Fused q/k/v projection: one (BS,H)x(H,3H) MXU dot.
        qkv = jnp.dot(x.astype(jnp.bfloat16), w_qkv,
                      preferred_element_type=jnp.float32) + b_qkv   # (BS, 3H) f32

        # Batched-einsum attention; heads folded into the output projection
        # (no lane concatenations).
        attn = jnp.zeros((BS, HIDDEN), jnp.float32)
        for h in range(NUM_HEADS):                                  # static (NH=2)
            lo = h * HEAD_DIM
            qh = (qkv[:, lo:lo + HEAD_DIM] * scale).reshape(B, S, HEAD_DIM)
            kh = qkv[:, HIDDEN + lo:HIDDEN + lo + HEAD_DIM].reshape(B, S, HEAD_DIM)
            vh = qkv[:, 2 * HIDDEN + lo:2 * HIDDEN + lo + HEAD_DIM].reshape(B, S, HEAD_DIM)
            s = jnp.einsum('bqd,bkd->bqk', qh, kh,
                           preferred_element_type=jnp.float32) + bias3       # (B,S,S)
            s = s - jnp.max(s, axis=-1, keepdims=True)
            p = jnp.exp(s)
            # approx reciprocal (EUP); ~1e-4 relative error vs exact softmax.
            p = p * pl.reciprocal(jnp.sum(p, axis=-1, keepdims=True), approx=True)
            ctx = jnp.einsum('bqk,bkd->bqd', p, vh,
                             preferred_element_type=jnp.float32)             # (B,S,DH)
            attn = attn + jnp.dot(ctx.reshape(BS, HEAD_DIM).astype(jnp.bfloat16),
                                  w_o[lo:lo + HEAD_DIM, :],
                                  preferred_element_type=jnp.float32)
        attn = attn + b_o

        h1 = _layernorm(x + attn, ln1_g, ln1_b)

        hid = jnp.dot(h1.astype(jnp.bfloat16), w1,
                      preferred_element_type=jnp.float32) + b1
        # TODO(synk): HF BERT's default hidden_act is the exact erf GELU; the tanh
        # approximation is kept here (EUP-friendly, tiny numeric delta).
        hid = jax.nn.gelu(hid, approximate=True)
        ffn = jnp.dot(hid.astype(jnp.bfloat16), w2,
                      preferred_element_type=jnp.float32) + b2
        x = _layernorm(h1 + ffn, ln2_g, ln2_b)

    # --- epilogue: CLS rows via selection-matrix matmul -> dropout(identity) -> regressor ---
    # TODO(synk): training-mode dropout would use pltpu.prng_seed + prng_random_bits.
    col = jax.lax.broadcasted_iota(jnp.int32, (B, BS), 1)
    tgt = jax.lax.broadcasted_iota(jnp.int32, (B, BS), 0) * S
    cls_sel = jnp.where(col == tgt, 1.0, 0.0).astype(jnp.float32)   # (B, BS)
    cls = jnp.dot(cls_sel, x, preferred_element_type=jnp.float32)   # (B, H)
    o_ref[...] = (jnp.dot(cls.astype(jnp.bfloat16), reg_w_ref[...],
                          preferred_element_type=jnp.float32)
                  + vrow(REG_B_ROW, NUM_OUTPUTS))


# ---------------- parameters (deterministic synthetic init) ----------------
def init_params(key):
    keys = iter(jax.random.split(key, 64))

    def dense(k, fan_in, fan_out):
        w = jax.random.normal(k, (fan_in, fan_out), jnp.float32) * 0.02
        b = jnp.zeros((1, fan_out), jnp.float32)
        return w, b

    params = {
        "word_emb": jax.random.normal(next(keys), (VOCAB, HIDDEN), jnp.float32) * 0.02,
        "pos_emb": jax.random.normal(next(keys), (MAX_POS, HIDDEN), jnp.float32) * 0.02,
        "type_emb": jax.random.normal(next(keys), (TYPE_VOCAB, HIDDEN), jnp.float32) * 0.02,
        "emb_ln_g": jnp.ones((1, HIDDEN), jnp.float32),
        "emb_ln_b": jnp.zeros((1, HIDDEN), jnp.float32),
        "layers": [],
    }
    for _ in range(NUM_LAYERS):
        lp = {}
        lp["wq"], lp["bq"] = dense(next(keys), HIDDEN, HIDDEN)
        lp["wk"], lp["bk"] = dense(next(keys), HIDDEN, HIDDEN)
        lp["wv"], lp["bv"] = dense(next(keys), HIDDEN, HIDDEN)
        lp["wo"], lp["bo"] = dense(next(keys), HIDDEN, HIDDEN)
        lp["ln1_g"] = jnp.ones((1, HIDDEN), jnp.float32)
        lp["ln1_b"] = jnp.zeros((1, HIDDEN), jnp.float32)
        lp["w1"], lp["b1"] = dense(next(keys), HIDDEN, FFN)
        lp["w2"], lp["b2"] = dense(next(keys), FFN, HIDDEN)
        lp["ln2_g"] = jnp.ones((1, HIDDEN), jnp.float32)
        lp["ln2_b"] = jnp.zeros((1, HIDDEN), jnp.float32)
        params["layers"].append(lp)
    params["reg_w"], params["reg_b"] = dense(next(keys), HIDDEN, NUM_OUTPUTS)
    return params


def pack_params(params):
    """Pack the ~40 small tensors into 6 contiguous slabs (done once)."""
    def row(v):
        v = v.reshape(1, -1)
        return jnp.pad(v, ((0, 0), (0, VEC_W - v.shape[1])))

    vec_rows = [row(params["emb_ln_g"]), row(params["emb_ln_b"])]
    attn_w, ffn_w1, ffn_w2 = [], [], []
    for lp in params["layers"]:
        attn_w.append(jnp.concatenate([lp["wq"], lp["wk"], lp["wv"], lp["wo"]], axis=1))
        ffn_w1.append(lp["w1"])
        ffn_w2.append(lp["w2"])
        vec_rows += [row(jnp.concatenate([lp["bq"], lp["bk"], lp["bv"]], axis=1)),
                     row(lp["bo"]), row(lp["ln1_g"]), row(lp["ln1_b"]),
                     row(lp["b1"]), row(lp["b2"]), row(lp["ln2_g"]), row(lp["ln2_b"])]
    vec_rows.append(row(params["reg_b"]))

    emb_tab = jnp.concatenate(
        [params["word_emb"], params["pos_emb"], params["type_emb"]], axis=0)

    return {
        "emb_tab": emb_tab.astype(jnp.float32),                    # (EMB_ROWS, H)
        "vec": jnp.concatenate(vec_rows, axis=0).astype(jnp.float32),  # (VEC_ROWS, 128)
        "attn_w": jnp.stack(attn_w).astype(jnp.bfloat16),          # (L, H, 4H)
        "ffn_w1": jnp.stack(ffn_w1).astype(jnp.bfloat16),          # (L, H, FFN)
        "ffn_w2": jnp.stack(ffn_w2).astype(jnp.bfloat16),          # (L, FFN, H)
        "reg_w": params["reg_w"].astype(jnp.bfloat16),             # (H, 4)
    }


# ---------------- forward (mirrors MultiOutputRegressor.forward) ----------------
def forward(packed, input_ids, attention_mask, labels=None):
    B, S = input_ids.shape
    assert S <= MAX_POS, "sequence length exceeds synthetic position table"
    BS = B * S

    # All-resident VMEM budget check (design must switch to a pipelined
    # per-layer grid well before this trips — v7x VMEM is 64 MiB).
    weight_bytes = sum(int(v.size) * v.dtype.itemsize for v in packed.values())
    assert weight_bytes < 8 * 1024 * 1024, "model too large for all-resident design"

    ids = input_ids.astype(jnp.int32).reshape(BS, 1)       # tiny; gathered in-kernel
    mask = attention_mask.astype(jnp.int32)                # (B, S)

    flops = 2 * BS * EMB_ROWS * HIDDEN
    flops += NUM_LAYERS * (2 * BS * HIDDEN * 3 * HIDDEN
                           + 2 * 2 * B * NUM_HEADS * S * S * HEAD_DIM
                           + 2 * BS * HIDDEN * HIDDEN
                           + 2 * 2 * BS * HIDDEN * FFN)
    flops += 2 * B * BS * HIDDEN + 2 * B * HIDDEN * NUM_OUTPUTS
    transcendentals = NUM_LAYERS * (B * NUM_HEADS * S * S + BS * FFN)
    bytes_accessed = (ids.size * 4 + mask.size * 4 + weight_bytes
                      + B * NUM_OUTPUTS * 4)

    kernel = functools.partial(fused_forward_kernel, B=B, S=S)
    vspec = pl.BlockSpec(memory_space=pltpu.MemorySpace.VMEM)

    # Single fused call, grid=() : whole model state (<100 KiB) is VMEM-resident
    # on v5e/v6e/v7x.  On v7x (2 TensorCores) a grid=(B,) batch axis with
    # dimension_semantics=("parallel",) and constant weight index_maps would use
    # both cores once B is large; at B=2 the extra grid steps are not worth it.
    logits = pl.pallas_call(
        kernel,
        out_shape=jax.ShapeDtypeStruct((B, NUM_OUTPUTS), jnp.float32),
        in_specs=[vspec] * 8,
        out_specs=vspec,
        cost_estimate=pl.CostEstimate(flops=int(flops),
                                      transcendentals=int(transcendentals),
                                      bytes_accessed=int(bytes_accessed)),
    )(ids, mask, packed["emb_tab"], packed["vec"],
      packed["attn_w"], packed["ffn_w1"], packed["ffn_w2"], packed["reg_w"])

    if labels is not None:
        loss = jnp.mean((logits - labels) ** 2)            # glue: tiny MSE
        return (loss, logits)
    return (logits,)


if __name__ == "__main__":
    key = jax.random.PRNGKey(0)
    pkey, dkey = jax.random.split(key)
    params = init_params(pkey)
    packed = pack_params(params)

    B, S = 2, 8
    input_ids = jax.random.randint(dkey, (B, S), 0, VOCAB, dtype=jnp.int32)
    attention_mask = jnp.ones((B, S), jnp.int32).at[1, 6:].set(0)

    (logits,) = forward(packed, input_ids, attention_mask)
    logits = jax.block_until_ready(logits)
    assert logits.shape == (B, NUM_OUTPUTS)
    assert bool(jnp.all(jnp.isfinite(logits)))
    print("KERNEL_OK")
</pallas_src>

<mosaic_0001>
module attributes {stable_mosaic.version = 11 : i64} {
  func.func @fused_forward_kernel(%arg0: memref<16x1xi32, #tpu.memory_space<vmem>>, %arg1: memref<2x8xi32, #tpu.memory_space<vmem>>, %arg2: memref<118x32xf32, #tpu.memory_space<vmem>>, %arg3: memref<19x128xf32, #tpu.memory_space<vmem>>, %arg4: memref<2x32x128xbf16, #tpu.memory_space<vmem>>, %arg5: memref<2x32x128xbf16, #tpu.memory_space<vmem>>, %arg6: memref<2x128x32xbf16, #tpu.memory_space<vmem>>, %arg7: memref<32x4xbf16, #tpu.memory_space<vmem>>, %arg8: memref<2x4xf32, #tpu.memory_space<vmem>>) attributes {dimension_semantics = [], scalar_prefetch = 0 : i64, scratch_operands = 0 : i64, tpu.core_type = #tpu.core_type<tc>} {
    %0 = tpu.iota {dimensions = array<i32: 1>} : vector<16x118xi32>
    %c0 = arith.constant 0 : index
    %c0_0 = arith.constant 0 : index
    %1 = vector.load %arg0[%c0, %c0_0] : memref<16x1xi32, #tpu.memory_space<vmem>>, vector<16x1xi32>
    %2 = tpu.iota {dimensions = array<i32: 0>} : vector<16x1xi32>
    %c7_i32 = arith.constant 7 : i32
    %3 = vector.broadcast %c7_i32 : i32 to vector<16x1xi32>
    %4 = arith.andi %2, %3 : vector<16x1xi32>
    %5 = vector.broadcast %1 : vector<16x1xi32> to vector<16x118xi32>
    %6 = arith.cmpi eq, %0, %5 : vector<16x118xi32>
    %c100_i32 = arith.constant 100 : i32
    %7 = vector.broadcast %c100_i32 : i32 to vector<16x1xi32>
    %8 = arith.addi %7, %4 : vector<16x1xi32>
    %9 = vector.broadcast %8 : vector<16x1xi32> to vector<16x118xi32>
    %10 = arith.cmpi eq, %0, %9 : vector<16x118xi32>
    %11 = arith.ori %6, %10 : vector<16x118xi1>
    %c116_i32 = arith.constant 116 : i32
    %12 = vector.broadcast %c116_i32 : i32 to vector<16x118xi32>
    %13 = arith.cmpi eq, %0, %12 : vector<16x118xi32>
    %14 = arith.ori %11, %13 : vector<16x118xi1>
    %cst = arith.constant 1.000000e+00 : f32
    %cst_1 = arith.constant 0.000000e+00 : f32
    %15 = vector.broadcast %cst : f32 to vector<16x118xf32>
    %16 = vector.broadcast %cst_1 : f32 to vector<16x118xf32>
    %17 = arith.select %14, %15, %16 : vector<16x118xi1>, vector<16x118xf32>
    %c0_2 = arith.constant 0 : index
    %c0_3 = arith.constant 0 : index
    %18 = vector.load %arg2[%c0_2, %c0_3] : memref<118x32xf32, #tpu.memory_space<vmem>>, vector<118x32xf32>
    %cst_4 = arith.constant dense<0.000000e+00> : vector<16x32xf32>
    %19 = tpu.matmul %17, %18, %cst_4 {dimension_numbers = #tpu.dot_dimension_numbers<[1], [0], [0], [1], [0, 0, 1, 1], [], []>} : vector<16x118xf32>, vector<118x32xf32>, vector<16x32xf32> -> vector<16x32xf32>
    %c0_5 = arith.constant 0 : index
    %c0_6 = arith.constant 0 : index
    %20 = vector.load %arg3[%c0_5, %c0_6] : memref<19x128xf32, #tpu.memory_space<vmem>>, vector<1x32xf32>
    %c1 = arith.constant 1 : index
    %c0_7 = arith.constant 0 : index
    %21 = vector.load %arg3[%c1, %c0_7] : memref<19x128xf32, #tpu.memory_space<vmem>>, vector<1x32xf32>
    %cst_8 = arith.constant dense<0.000000e+00> : vector<16xf32>
    %22 = vector.multi_reduction <add>, %19, %cst_8 [1] : vector<16x32xf32> to vector<16xf32>
    %23 = vector.shape_cast %22 : vector<16xf32> to vector<16x1xf32>
    %cst_9 = arith.constant 3.200000e+01 : f32
    %24 = vector.broadcast %cst_9 : f32 to vector<16x1xf32>
    %25 = arith.divf %23, %24 : vector<16x1xf32>
    %26 = vector.broadcast %25 : vector<16x1xf32> to vector<16x32xf32>
    %27 = arith.subf %19, %26 : vector<16x32xf32>
    %28 = arith.mulf %27, %27 : vector<16x32xf32>
    %cst_10 = arith.constant dense<0.000000e+00> : vector<16xf32>
    %29 = vector.multi_reduction <add>, %28, %cst_10 [1] : vector<16x32xf32> to vector<16xf32>
    %30 = vector.shape_cast %29 : vector<16xf32> to vector<16x1xf32>
    %cst_11 = arith.constant 3.200000e+01 : f32
    %31 = vector.broadcast %cst_11 : f32 to vector<16x1xf32>
    %32 = arith.divf %30, %31 : vector<16x1xf32>
    %33 = vector.broadcast %25 : vector<16x1xf32> to vector<16x32xf32>
    %34 = arith.subf %19, %33 : vector<16x32xf32>
    %cst_12 = arith.constant 9.99999996E-13 : f32
    %35 = vector.broadcast %cst_12 : f32 to vector<16x1xf32>
    %36 = arith.addf %32, %35 : vector<16x1xf32>
    %37 = math.rsqrt %36 : vector<16x1xf32>
    %38 = vector.broadcast %37 : vector<16x1xf32> to vector<16x32xf32>
    %39 = arith.mulf %34, %38 : vector<16x32xf32>
    %40 = vector.broadcast %20 : vector<1x32xf32> to vector<16x32xf32>
    %41 = arith.mulf %39, %40 : vector<16x32xf32>
    %42 = vector.broadcast %21 : vector<1x32xf32> to vector<16x32xf32>
    %43 = arith.addf %41, %42 : vector<16x32xf32>
    %c0_13 = arith.constant 0 : index
    %c0_14 = arith.constant 0 : index
    %44 = vector.load %arg1[%c0_13, %c0_14] : memref<2x8xi32, #tpu.memory_space<vmem>>, vector<2x8xi32>
    %c0_i32 = arith.constant 0 : i32
    %45 = vector.broadcast %c0_i32 : i32 to vector<2x8xi32>
    %46 = arith.cmpi eq, %44, %45 : vector<2x8xi32>
    %cst_15 = arith.constant -1.000000e+09 : f32
    %cst_16 = arith.constant 0.000000e+00 : f32
    %47 = vector.broadcast %cst_15 : f32 to vector<2x8xf32>
    %48 = vector.broadcast %cst_16 : f32 to vector<2x8xf32>
    %49 = arith.select %46, %47, %48 : vector<2x8xi1>, vector<2x8xf32>
    %50 = vector.shape_cast %49 : vector<2x8xf32> to vector<2x1x8xf32>
    %51 = vector.shape_cast %50 : vector<2x1x8xf32> to vector<2x1x8xf32>
    %52 = vector.broadcast %51 : vector<2x1x8xf32> to vector<2x8x8xf32>
    %c0_17 = arith.constant 0 : index
    %c0_18 = arith.constant 0 : index
    %c0_19 = arith.constant 0 : index
    %53 = vector.load %arg4[%c0_17, %c0_18, %c0_19] : memref<2x32x128xbf16, #tpu.memory_space<vmem>>, vector<1x32x128xbf16>
    %54 = vector.shape_cast %53 : vector<1x32x128xbf16> to vector<32x128xbf16>
    %55 = vector.extract_strided_slice %54 {offsets = [0, 0], sizes = [32, 96], strides = [1, 1]} : vector<32x128xbf16> to vector<32x96xbf16>
    %56 = vector.extract_strided_slice %54 {offsets = [0, 96], sizes = [32, 32], strides = [1, 1]} : vector<32x128xbf16> to vector<32x32xbf16>
    %c0_20 = arith.constant 0 : index
    %c0_21 = arith.constant 0 : index
    %c0_22 = arith.constant 0 : index
    %57 = vector.load %arg5[%c0_20, %c0_21, %c0_22] : memref<2x32x128xbf16, #tpu.memory_space<vmem>>, vector<1x32x128xbf16>
    %58 = vector.shape_cast %57 : vector<1x32x128xbf16> to vector<32x128xbf16>
    %c0_23 = arith.constant 0 : index
    %c0_24 = arith.constant 0 : index
    %c0_25 = arith.constant 0 : index
    %59 = vector.load %arg6[%c0_23, %c0_24, %c0_25] : memref<2x128x32xbf16, #tpu.memory_space<vmem>>, vector<1x128x32xbf16>
    %60 = vector.shape_cast %59 : vector<1x128x32xbf16> to vector<128x32xbf16>
    %c2 = arith.constant 2 : index
    %c0_26 = arith.constant 0 : index
    %61 = vector.load %arg3[%c2, %c0_26] : memref<19x128xf32, #tpu.memory_space<vmem>>, vector<1x96xf32>
    %c3 = arith.constant 3 : index
    %c0_27 = arith.constant 0 : index
    %62 = vector.load %arg3[%c3, %c0_27] : memref<19x128xf32, #tpu.memory_space<vmem>>, vector<1x32xf32>
    %c4 = arith.constant 4 : index
    %c0_28 = arith.constant 0 : index
    %63 = vector.load %arg3[%c4, %c0_28] : memref<19x128xf32, #tpu.memory_space<vmem>>, vector<1x32xf32>
    %c5 = arith.constant 5 : index
    %c0_29 = arith.constant 0 : index
    %64 = vector.load %arg3[%c5, %c0_29] : memref<19x128xf32, #tpu.memory_space<vmem>>, vector<1x32xf32>
    %c6 = arith.constant 6 : index
    %c0_30 = arith.constant 0 : index
    %65 = vector.load %arg3[%c6, %c0_30] : memref<19x128xf32, #tpu.memory_space<vmem>>, vector<1x128xf32>
    %c7 = arith.constant 7 : index
    %c0_31 = arith.constant 0 : index
    %66 = vector.load %arg3[%c7, %c0_31] : memref<19x128xf32, #tpu.memory_space<vmem>>, vector<1x32xf32>
    %c8 = arith.constant 8 : index
    %c0_32 = arith.constant 0 : index
    %67 = vector.load %arg3[%c8, %c0_32] : memref<19x128xf32, #tpu.memory_space<vmem>>, vector<1x32xf32>
    %c9 = arith.constant 9 : index
    %c0_33 = arith.constant 0 : index
    %68 = vector.load %arg3[%c9, %c0_33] : memref<19x128xf32, #tpu.memory_space<vmem>>, vector<1x32xf32>
    %69 = arith.truncf %43 : vector<16x32xf32> to vector<16x32xbf16>
    %cst_34 = arith.constant dense<0.000000e+00> : vector<16x96xf32>
    %70 = tpu.matmul %69, %55, %cst_34 {dimension_numbers = #tpu.dot_dimension_numbers<[1], [0], [0], [1], [0, 0, 1, 1], [], []>} : vector<16x32xbf16>, vector<32x96xbf16>, vector<16x96xf32> -> vector<16x96xf32>
    %71 = vector.broadcast %61 : vector<1x96xf32> to vector<16x96xf32>
    %72 = arith.addf %70, %71 : vector<16x96xf32>
    %cst_35 = arith.constant 0.000000e+00 : f32
    %73 = vector.broadcast %cst_35 : f32 to vector<16x32xf32>
    %74 = vector.extract_strided_slice %72 {offsets = [0, 0], sizes = [16, 16], strides = [1, 1]} : vector<16x96xf32> to vector<16x16xf32>
    %cst_36 = arith.constant 2.500000e-01 : f32
    %75 = vector.broadcast %cst_36 : f32 to vector<16x16xf32>
    %76 = arith.mulf %74, %75 : vector<16x16xf32>
    %77 = vector.shape_cast %76 : vector<16x16xf32> to vector<2x8x16xf32>
    %78 = vector.extract_strided_slice %72 {offsets = [0, 32], sizes = [16, 16], strides = [1, 1]} : vector<16x96xf32> to vector<16x16xf32>
    %79 = vector.shape_cast %78 : vector<16x16xf32> to vector<2x8x16xf32>
    %80 = vector.extract_strided_slice %72 {offsets = [0, 64], sizes = [16, 16], strides = [1, 1]} : vector<16x96xf32> to vector<16x16xf32>
    %81 = vector.shape_cast %80 : vector<16x16xf32> to vector<2x8x16xf32>
    "tpu.trace_start"() <{level = 10 : i32, message = "bqd,bkd->bqk"}> : () -> ()
    %cst_37 = arith.constant dense<0.000000e+00> : vector<2x8x8xf32>
    %82 = tpu.matmul %77, %79, %cst_37 {dimension_numbers = #tpu.dot_dimension_numbers<[2], [2], [1], [1], [0, 0, 0, 1, 1, 1], [0], [0]>} : vector<2x8x16xf32>, vector<2x8x16xf32>, vector<2x8x8xf32> -> vector<2x8x8xf32>
    "tpu.trace_stop"() : () -> ()
    %83 = arith.addf %82, %52 : vector<2x8x8xf32>
    %cst_38 = arith.constant dense<0xFF800000> : vector<2x8xf32>
    %84 = vector.multi_reduction <maximumf>, %83, %cst_38 [2] : vector<2x8x8xf32> to vector<2x8xf32>
    %85 = vector.shape_cast %84 : vector<2x8xf32> to vector<2x8x1xf32>
    %86 = vector.broadcast %85 : vector<2x8x1xf32> to vector<2x8x8xf32>
    %87 = arith.subf %83, %86 : vector<2x8x8xf32>
    %88 = math.exp %87 : vector<2x8x8xf32>
    %cst_39 = arith.constant dense<0.000000e+00> : vector<2x8xf32>
    %89 = vector.multi_reduction <add>, %88, %cst_39 [2] : vector<2x8x8xf32> to vector<2x8xf32>
    %90 = vector.shape_cast %89 : vector<2x8xf32> to vector<2x8x1xf32>
    %91 = tpu.reciprocal %90 {approx = true} : vector<2x8x1xf32> -> vector<2x8x1xf32>
    %92 = vector.broadcast %91 : vector<2x8x1xf32> to vector<2x8x8xf32>
    %93 = arith.mulf %88, %92 : vector<2x8x8xf32>
    "tpu.trace_start"() <{level = 10 : i32, message = "bqk,bkd->bqd"}> : () -> ()
    %cst_40 = arith.constant dense<0.000000e+00> : vector<2x8x16xf32>
    %94 = tpu.matmul %93, %81, %cst_40 {dimension_numbers = #tpu.dot_dimension_numbers<[2], [1], [1], [2], [0, 0, 0, 1, 1, 2], [0], [0]>} : vector<2x8x8xf32>, vector<2x8x16xf32>, vector<2x8x16xf32> -> vector<2x8x16xf32>
    "tpu.trace_stop"() : () -> ()
    %95 = vector.shape_cast %94 : vector<2x8x16xf32> to vector<16x16xf32>
    %96 = arith.truncf %95 : vector<16x16xf32> to vector<16x16xbf16>
    %97 = vector.extract_strided_slice %56 {offsets = [0, 0], sizes = [16, 32], strides = [1, 1]} : vector<32x32xbf16> to vector<16x32xbf16>
    %cst_41 = arith.constant dense<0.000000e+00> : vector<16x32xf32>
    %98 = tpu.matmul %96, %97, %cst_41 {dimension_numbers = #tpu.dot_dimension_numbers<[1], [0], [0], [1], [0, 0, 1, 1], [], []>} : vector<16x16xbf16>, vector<16x32xbf16>, vector<16x32xf32> -> vector<16x32xf32>
    %99 = arith.addf %73, %98 : vector<16x32xf32>
    %100 = vector.extract_strided_slice %72 {offsets = [0, 16], sizes = [16, 16], strides = [1, 1]} : vector<16x96xf32> to vector<16x16xf32>
    %cst_42 = arith.constant 2.500000e-01 : f32
    %101 = vector.broadcast %cst_42 : f32 to vector<16x16xf32>
    %102 = arith.mulf %100, %101 : vector<16x16xf32>
    %103 = vector.shape_cast %102 : vector<16x16xf32> to vector<2x8x16xf32>
    %104 = vector.extract_strided_slice %72 {offsets = [0, 48], sizes = [16, 16], strides = [1, 1]} : vector<16x96xf32> to vector<16x16xf32>
    %105 = vector.shape_cast %104 : vector<16x16xf32> to vector<2x8x16xf32>
    %106 = vector.extract_strided_slice %72 {offsets = [0, 80], sizes = [16, 16], strides = [1, 1]} : vector<16x96xf32> to vector<16x16xf32>
    %107 = vector.shape_cast %106 : vector<16x16xf32> to vector<2x8x16xf32>
    "tpu.trace_start"() <{level = 10 : i32, message = "bqd,bkd->bqk"}> : () -> ()
    %cst_43 = arith.constant dense<0.000000e+00> : vector<2x8x8xf32>
    %108 = tpu.matmul %103, %105, %cst_43 {dimension_numbers = #tpu.dot_dimension_numbers<[2], [2], [1], [1], [0, 0, 0, 1, 1, 1], [0], [0]>} : vector<2x8x16xf32>, vector<2x8x16xf32>, vector<2x8x8xf32> -> vector<2x8x8xf32>
    "tpu.trace_stop"() : () -> ()
    %109 = arith.addf %108, %52 : vector<2x8x8xf32>
    %cst_44 = arith.constant dense<0xFF800000> : vector<2x8xf32>
    %110 = vector.multi_reduction <maximumf>, %109, %cst_44 [2] : vector<2x8x8xf32> to vector<2x8xf32>
    %111 = vector.shape_cast %110 : vector<2x8xf32> to vector<2x8x1xf32>
    %112 = vector.broadcast %111 : vector<2x8x1xf32> to vector<2x8x8xf32>
    %113 = arith.subf %109, %112 : vector<2x8x8xf32>
    %114 = math.exp %113 : vector<2x8x8xf32>
    %cst_45 = arith.constant dense<0.000000e+00> : vector<2x8xf32>
    %115 = vector.multi_reduction <add>, %114, %cst_45 [2] : vector<2x8x8xf32> to vector<2x8xf32>
    %116 = vector.shape_cast %115 : vector<2x8xf32> to vector<2x8x1xf32>
    %117 = tpu.reciprocal %116 {approx = true} : vector<2x8x1xf32> -> vector<2x8x1xf32>
    %118 = vector.broadcast %117 : vector<2x8x1xf32> to vector<2x8x8xf32>
    %119 = arith.mulf %114, %118 : vector<2x8x8xf32>
    "tpu.trace_start"() <{level = 10 : i32, message = "bqk,bkd->bqd"}> : () -> ()
    %cst_46 = arith.constant dense<0.000000e+00> : vector<2x8x16xf32>
    %120 = tpu.matmul %119, %107, %cst_46 {dimension_numbers = #tpu.dot_dimension_numbers<[2], [1], [1], [2], [0, 0, 0, 1, 1, 2], [0], [0]>} : vector<2x8x8xf32>, vector<2x8x16xf32>, vector<2x8x16xf32> -> vector<2x8x16xf32>
    "tpu.trace_stop"() : () -> ()
    %121 = vector.shape_cast %120 : vector<2x8x16xf32> to vector<16x16xf32>
    %122 = arith.truncf %121 : vector<16x16xf32> to vector<16x16xbf16>
    %123 = vector.extract_strided_slice %56 {offsets = [16, 0], sizes = [16, 32], strides = [1, 1]} : vector<32x32xbf16> to vector<16x32xbf16>
    %cst_47 = arith.constant dense<0.000000e+00> : vector<16x32xf32>
    %124 = tpu.matmul %122, %123, %cst_47 {dimension_numbers = #tpu.dot_dimension_numbers<[1], [0], [0], [1], [0, 0, 1, 1], [], []>} : vector<16x16xbf16>, vector<16x32xbf16>, vector<16x32xf32> -> vector<16x32xf32>
    %125 = arith.addf %99, %124 : vector<16x32xf32>
    %126 = vector.broadcast %62 : vector<1x32xf32> to vector<16x32xf32>
    %127 = arith.addf %125, %126 : vector<16x32xf32>
    %128 = arith.addf %43, %127 : vector<16x32xf32>
    %cst_48 = arith.constant dense<0.000000e+00> : vector<16xf32>
    %129 = vector.multi_reduction <add>, %128, %cst_48 [1] : vector<16x32xf32> to vector<16xf32>
    %130 = vector.shape_cast %129 : vector<16xf32> to vector<16x1xf32>
    %cst_49 = arith.constant 3.200000e+01 : f32
    %131 = vector.broadcast %cst_49 : f32 to vector<16x1xf32>
    %132 = arith.divf %130, %131 : vector<16x1xf32>
    %133 = vector.broadcast %132 : vector<16x1xf32> to vector<16x32xf32>
    %134 = arith.subf %128, %133 : vector<16x32xf32>
    %135 = arith.mulf %134, %134 : vector<16x32xf32>
    %cst_50 = arith.constant dense<0.000000e+00> : vector<16xf32>
    %136 = vector.multi_reduction <add>, %135, %cst_50 [1] : vector<16x32xf32> to vector<16xf32>
    %137 = vector.shape_cast %136 : vector<16xf32> to vector<16x1xf32>
    %cst_51 = arith.constant 3.200000e+01 : f32
    %138 = vector.broadcast %cst_51 : f32 to vector<16x1xf32>
    %139 = arith.divf %137, %138 : vector<16x1xf32>
    %140 = vector.broadcast %132 : vector<16x1xf32> to vector<16x32xf32>
    %141 = arith.subf %128, %140 : vector<16x32xf32>
    %cst_52 = arith.constant 9.99999996E-13 : f32
    %142 = vector.broadcast %cst_52 : f32 to vector<16x1xf32>
    %143 = arith.addf %139, %142 : vector<16x1xf32>
    %144 = math.rsqrt %143 : vector<16x1xf32>
    %145 = vector.broadcast %144 : vector<16x1xf32> to vector<16x32xf32>
    %146 = arith.mulf %141, %145 : vector<16x32xf32>
    %147 = vector.broadcast %63 : vector<1x32xf32> to vector<16x32xf32>
    %148 = arith.mulf %146, %147 : vector<16x32xf32>
    %149 = vector.broadcast %64 : vector<1x32xf32> to vector<16x32xf32>
    %150 = arith.addf %148, %149 : vector<16x32xf32>
    %151 = arith.truncf %150 : vector<16x32xf32> to vector<16x32xbf16>
    %cst_53 = arith.constant dense<0.000000e+00> : vector<16x128xf32>
    %152 = tpu.matmul %151, %58, %cst_53 {dimension_numbers = #tpu.dot_dimension_numbers<[1], [0], [0], [1], [0, 0, 1, 1], [], []>} : vector<16x32xbf16>, vector<32x128xbf16>, vector<16x128xf32> -> vector<16x128xf32>
    %153 = vector.broadcast %65 : vector<1x128xf32> to vector<16x128xf32>
    %154 = arith.addf %152, %153 : vector<16x128xf32>
    %155 = arith.mulf %154, %154 : vector<16x128xf32>
    %156 = arith.mulf %154, %155 : vector<16x128xf32>
    %cst_54 = arith.constant 4.471500e-02 : f32
    %157 = vector.broadcast %cst_54 : f32 to vector<16x128xf32>
    %158 = arith.mulf %157, %156 : vector<16x128xf32>
    %159 = arith.addf %154, %158 : vector<16x128xf32>
    %cst_55 = arith.constant 0.797884583 : f32
    %160 = vector.broadcast %cst_55 : f32 to vector<16x128xf32>
    %161 = arith.mulf %160, %159 : vector<16x128xf32>
    %162 = math.tanh %161 : vector<16x128xf32>
    %cst_56 = arith.constant 1.000000e+00 : f32
    %163 = vector.broadcast %cst_56 : f32 to vector<16x128xf32>
    %164 = arith.addf %163, %162 : vector<16x128xf32>
    %cst_57 = arith.constant 5.000000e-01 : f32
    %165 = vector.broadcast %cst_57 : f32 to vector<16x128xf32>
    %166 = arith.mulf %165, %164 : vector<16x128xf32>
    %167 = arith.mulf %154, %166 : vector<16x128xf32>
    %168 = arith.truncf %167 : vector<16x128xf32> to vector<16x128xbf16>
    %cst_58 = arith.constant dense<0.000000e+00> : vector<16x32xf32>
    %169 = tpu.matmul %168, %60, %cst_58 {dimension_numbers = #tpu.dot_dimension_numbers<[1], [0], [0], [1], [0, 0, 1, 1], [], []>} : vector<16x128xbf16>, vector<128x32xbf16>, vector<16x32xf32> -> vector<16x32xf32>
    %170 = vector.broadcast %66 : vector<1x32xf32> to vector<16x32xf32>
    %171 = arith.addf %169, %170 : vector<16x32xf32>
    %172 = arith.addf %150, %171 : vector<16x32xf32>
    %cst_59 = arith.constant dense<0.000000e+00> : vector<16xf32>
    %173 = vector.multi_reduction <add>, %172, %cst_59 [1] : vector<16x32xf32> to vector<16xf32>
    %174 = vector.shape_cast %173 : vector<16xf32> to vector<16x1xf32>
    %cst_60 = arith.constant 3.200000e+01 : f32
    %175 = vector.broadcast %cst_60 : f32 to vector<16x1xf32>
    %176 = arith.divf %174, %175 : vector<16x1xf32>
    %177 = vector.broadcast %176 : vector<16x1xf32> to vector<16x32xf32>
    %178 = arith.subf %172, %177 : vector<16x32xf32>
    %179 = arith.mulf %178, %178 : vector<16x32xf32>
    %cst_61 = arith.constant dense<0.000000e+00> : vector<16xf32>
    %180 = vector.multi_reduction <add>, %179, %cst_61 [1] : vector<16x32xf32> to vector<16xf32>
    %181 = vector.shape_cast %180 : vector<16xf32> to vector<16x1xf32>
    %cst_62 = arith.constant 3.200000e+01 : f32
    %182 = vector.broadcast %cst_62 : f32 to vector<16x1xf32>
    %183 = arith.divf %181, %182 : vector<16x1xf32>
    %184 = vector.broadcast %176 : vector<16x1xf32> to vector<16x32xf32>
    %185 = arith.subf %172, %184 : vector<16x32xf32>
    %cst_63 = arith.constant 9.99999996E-13 : f32
    %186 = vector.broadcast %cst_63 : f32 to vector<16x1xf32>
    %187 = arith.addf %183, %186 : vector<16x1xf32>
    %188 = math.rsqrt %187 : vector<16x1xf32>
    %189 = vector.broadcast %188 : vector<16x1xf32> to vector<16x32xf32>
    %190 = arith.mulf %185, %189 : vector<16x32xf32>
    %191 = vector.broadcast %67 : vector<1x32xf32> to vector<16x32xf32>
    %192 = arith.mulf %190, %191 : vector<16x32xf32>
    %193 = vector.broadcast %68 : vector<1x32xf32> to vector<16x32xf32>
    %194 = arith.addf %192, %193 : vector<16x32xf32>
    %c1_64 = arith.constant 1 : index
    %c0_65 = arith.constant 0 : index
    %c0_66 = arith.constant 0 : index
    %195 = vector.load %arg4[%c1_64, %c0_65, %c0_66] : memref<2x32x128xbf16, #tpu.memory_space<vmem>>, vector<1x32x128xbf16>
    %196 = vector.shape_cast %195 : vector<1x32x128xbf16> to vector<32x128xbf16>
    %197 = vector.extract_strided_slice %196 {offsets = [0, 0], sizes = [32, 96], strides = [1, 1]} : vector<32x128xbf16> to vector<32x96xbf16>
    %198 = vector.extract_strided_slice %196 {offsets = [0, 96], sizes = [32, 32], strides = [1, 1]} : vector<32x128xbf16> to vector<32x32xbf16>
    %c1_67 = arith.constant 1 : index
    %c0_68 = arith.constant 0 : index
    %c0_69 = arith.constant 0 : index
    %199 = vector.load %arg5[%c1_67, %c0_68, %c0_69] : memref<2x32x128xbf16, #tpu.memory_space<vmem>>, vector<1x32x128xbf16>
    %200 = vector.shape_cast %199 : vector<1x32x128xbf16> to vector<32x128xbf16>
    %c1_70 = arith.constant 1 : index
    %c0_71 = arith.constant 0 : index
    %c0_72 = arith.constant 0 : index
    %201 = vector.load %arg6[%c1_70, %c0_71, %c0_72] : memref<2x128x32xbf16, #tpu.memory_space<vmem>>, vector<1x128x32xbf16>
    %202 = vector.shape_cast %201 : vector<1x128x32xbf16> to vector<128x32xbf16>
    %c10 = arith.constant 10 : index
    %c0_73 = arith.constant 0 : index
    %203 = vector.load %arg3[%c10, %c0_73] : memref<19x128xf32, #tpu.memory_space<vmem>>, vector<1x96xf32>
    %c11 = arith.constant 11 : index
    %c0_74 = arith.constant 0 : index
    %204 = vector.load %arg3[%c11, %c0_74] : memref<19x128xf32, #tpu.memory_space<vmem>>, vector<1x32xf32>
    %c12 = arith.constant 12 : index
    %c0_75 = arith.constant 0 : index
    %205 = vector.load %arg3[%c12, %c0_75] : memref<19x128xf32, #tpu.memory_space<vmem>>, vector<1x32xf32>
    %c13 = arith.constant 13 : index
    %c0_76 = arith.constant 0 : index
    %206 = vector.load %arg3[%c13, %c0_76] : memref<19x128xf32, #tpu.memory_space<vmem>>, vector<1x32xf32>
    %c14 = arith.constant 14 : index
    %c0_77 = arith.constant 0 : index
    %207 = vector.load %arg3[%c14, %c0_77] : memref<19x128xf32, #tpu.memory_space<vmem>>, vector<1x128xf32>
    %c15 = arith.constant 15 : index
    %c0_78 = arith.constant 0 : index
    %208 = vector.load %arg3[%c15, %c0_78] : memref<19x128xf32, #tpu.memory_space<vmem>>, vector<1x32xf32>
    %c16 = arith.constant 16 : index
    %c0_79 = arith.constant 0 : index
    %209 = vector.load %arg3[%c16, %c0_79] : memref<19x128xf32, #tpu.memory_space<vmem>>, vector<1x32xf32>
    %c17 = arith.constant 17 : index
    %c0_80 = arith.constant 0 : index
    %210 = vector.load %arg3[%c17, %c0_80] : memref<19x128xf32, #tpu.memory_space<vmem>>, vector<1x32xf32>
    %211 = arith.truncf %194 : vector<16x32xf32> to vector<16x32xbf16>
    %cst_81 = arith.constant dense<0.000000e+00> : vector<16x96xf32>
    %212 = tpu.matmul %211, %197, %cst_81 {dimension_numbers = #tpu.dot_dimension_numbers<[1], [0], [0], [1], [0, 0, 1, 1], [], []>} : vector<16x32xbf16>, vector<32x96xbf16>, vector<16x96xf32> -> vector<16x96xf32>
    %213 = vector.broadcast %203 : vector<1x96xf32> to vector<16x96xf32>
    %214 = arith.addf %212, %213 : vector<16x96xf32>
    %cst_82 = arith.constant 0.000000e+00 : f32
    %215 = vector.broadcast %cst_82 : f32 to vector<16x32xf32>
    %216 = vector.extract_strided_slice %214 {offsets = [0, 0], sizes = [16, 16], strides = [1, 1]} : vector<16x96xf32> to vector<16x16xf32>
    %cst_83 = arith.constant 2.500000e-01 : f32
    %217 = vector.broadcast %cst_83 : f32 to vector<16x16xf32>
    %218 = arith.mulf %216, %217 : vector<16x16xf32>
    %219 = vector.shape_cast %218 : vector<16x16xf32> to vector<2x8x16xf32>
    %220 = vector.extract_strided_slice %214 {offsets = [0, 32], sizes = [16, 16], strides = [1, 1]} : vector<16x96xf32> to vector<16x16xf32>
    %221 = vector.shape_cast %220 : vector<16x16xf32> to vector<2x8x16xf32>
    %222 = vector.extract_strided_slice %214 {offsets = [0, 64], sizes = [16, 16], strides = [1, 1]} : vector<16x96xf32> to vector<16x16xf32>
    %223 = vector.shape_cast %222 : vector<16x16xf32> to vector<2x8x16xf32>
    "tpu.trace_start"() <{level = 10 : i32, message = "bqd,bkd->bqk"}> : () -> ()
    %cst_84 = arith.constant dense<0.000000e+00> : vector<2x8x8xf32>
    %224 = tpu.matmul %219, %221, %cst_84 {dimension_numbers = #tpu.dot_dimension_numbers<[2], [2], [1], [1], [0, 0, 0, 1, 1, 1], [0], [0]>} : vector<2x8x16xf32>, vector<2x8x16xf32>, vector<2x8x8xf32> -> vector<2x8x8xf32>
    "tpu.trace_stop"() : () -> ()
    %225 = arith.addf %224, %52 : vector<2x8x8xf32>
    %cst_85 = arith.constant dense<0xFF800000> : vector<2x8xf32>
    %226 = vector.multi_reduction <maximumf>, %225, %cst_85 [2] : vector<2x8x8xf32> to vector<2x8xf32>
    %227 = vector.shape_cast %226 : vector<2x8xf32> to vector<2x8x1xf32>
    %228 = vector.broadcast %227 : vector<2x8x1xf32> to vector<2x8x8xf32>
    %229 = arith.subf %225, %228 : vector<2x8x8xf32>
    %230 = math.exp %229 : vector<2x8x8xf32>
    %cst_86 = arith.constant dense<0.000000e+00> : vector<2x8xf32>
    %231 = vector.multi_reduction <add>, %230, %cst_86 [2] : vector<2x8x8xf32> to vector<2x8xf32>
    %232 = vector.shape_cast %231 : vector<2x8xf32> to vector<2x8x1xf32>
    %233 = tpu.reciprocal %232 {approx = true} : vector<2x8x1xf32> -> vector<2x8x1xf32>
    %234 = vector.broadcast %233 : vector<2x8x1xf32> to vector<2x8x8xf32>
    %235 = arith.mulf %230, %234 : vector<2x8x8xf32>
    "tpu.trace_start"() <{level = 10 : i32, message = "bqk,bkd->bqd"}> : () -> ()
    %cst_87 = arith.constant dense<0.000000e+00> : vector<2x8x16xf32>
    %236 = tpu.matmul %235, %223, %cst_87 {dimension_numbers = #tpu.dot_dimension_numbers<[2], [1], [1], [2], [0, 0, 0, 1, 1, 2], [0], [0]>} : vector<2x8x8xf32>, vector<2x8x16xf32>, vector<2x8x16xf32> -> vector<2x8x16xf32>
    "tpu.trace_stop"() : () -> ()
    %237 = vector.shape_cast %236 : vector<2x8x16xf32> to vector<16x16xf32>
    %238 = arith.truncf %237 : vector<16x16xf32> to vector<16x16xbf16>
    %239 = vector.extract_strided_slice %198 {offsets = [0, 0], sizes = [16, 32], strides = [1, 1]} : vector<32x32xbf16> to vector<16x32xbf16>
    %cst_88 = arith.constant dense<0.000000e+00> : vector<16x32xf32>
    %240 = tpu.matmul %238, %239, %cst_88 {dimension_numbers = #tpu.dot_dimension_numbers<[1], [0], [0], [1], [0, 0, 1, 1], [], []>} : vector<16x16xbf16>, vector<16x32xbf16>, vector<16x32xf32> -> vector<16x32xf32>
    %241 = arith.addf %215, %240 : vector<16x32xf32>
    %242 = vector.extract_strided_slice %214 {offsets = [0, 16], sizes = [16, 16], strides = [1, 1]} : vector<16x96xf32> to vector<16x16xf32>
    %cst_89 = arith.constant 2.500000e-01 : f32
    %243 = vector.broadcast %cst_89 : f32 to vector<16x16xf32>
    %244 = arith.mulf %242, %243 : vector<16x16xf32>
    %245 = vector.shape_cast %244 : vector<16x16xf32> to vector<2x8x16xf32>
    %246 = vector.extract_strided_slice %214 {offsets = [0, 48], sizes = [16, 16], strides = [1, 1]} : vector<16x96xf32> to vector<16x16xf32>
    %247 = vector.shape_cast %246 : vector<16x16xf32> to vector<2x8x16xf32>
    %248 = vector.extract_strided_slice %214 {offsets = [0, 80], sizes = [16, 16], strides = [1, 1]} : vector<16x96xf32> to vector<16x16xf32>
    %249 = vector.shape_cast %248 : vector<16x16xf32> to vector<2x8x16xf32>
    "tpu.trace_start"() <{level = 10 : i32, message = "bqd,bkd->bqk"}> : () -> ()
    %cst_90 = arith.constant dense<0.000000e+00> : vector<2x8x8xf32>
    %250 = tpu.matmul %245, %247, %cst_90 {dimension_numbers = #tpu.dot_dimension_numbers<[2], [2], [1], [1], [0, 0, 0, 1, 1, 1], [0], [0]>} : vector<2x8x16xf32>, vector<2x8x16xf32>, vector<2x8x8xf32> -> vector<2x8x8xf32>
    "tpu.trace_stop"() : () -> ()
    %251 = arith.addf %250, %52 : vector<2x8x8xf32>
    %cst_91 = arith.constant dense<0xFF800000> : vector<2x8xf32>
    %252 = vector.multi_reduction <maximumf>, %251, %cst_91 [2] : vector<2x8x8xf32> to vector<2x8xf32>
    %253 = vector.shape_cast %252 : vector<2x8xf32> to vector<2x8x1xf32>
    %254 = vector.broadcast %253 : vector<2x8x1xf32> to vector<2x8x8xf32>
    %255 = arith.subf %251, %254 : vector<2x8x8xf32>
    %256 = math.exp %255 : vector<2x8x8xf32>
    %cst_92 = arith.constant dense<0.000000e+00> : vector<2x8xf32>
    %257 = vector.multi_reduction <add>, %256, %cst_92 [2] : vector<2x8x8xf32> to vector<2x8xf32>
    %258 = vector.shape_cast %257 : vector<2x8xf32> to vector<2x8x1xf32>
    %259 = tpu.reciprocal %258 {approx = true} : vector<2x8x1xf32> -> vector<2x8x1xf32>
    %260 = vector.broadcast %259 : vector<2x8x1xf32> to vector<2x8x8xf32>
    %261 = arith.mulf %256, %260 : vector<2x8x8xf32>
    "tpu.trace_start"() <{level = 10 : i32, message = "bqk,bkd->bqd"}> : () -> ()
    %cst_93 = arith.constant dense<0.000000e+00> : vector<2x8x16xf32>
    %262 = tpu.matmul %261, %249, %cst_93 {dimension_numbers = #tpu.dot_dimension_numbers<[2], [1], [1], [2], [0, 0, 0, 1, 1, 2], [0], [0]>} : vector<2x8x8xf32>, vector<2x8x16xf32>, vector<2x8x16xf32> -> vector<2x8x16xf32>
    "tpu.trace_stop"() : () -> ()
    %263 = vector.shape_cast %262 : vector<2x8x16xf32> to vector<16x16xf32>
    %264 = arith.truncf %263 : vector<16x16xf32> to vector<16x16xbf16>
    %265 = vector.extract_strided_slice %198 {offsets = [16, 0], sizes = [16, 32], strides = [1, 1]} : vector<32x32xbf16> to vector<16x32xbf16>
    %cst_94 = arith.constant dense<0.000000e+00> : vector<16x32xf32>
    %266 = tpu.matmul %264, %265, %cst_94 {dimension_numbers = #tpu.dot_dimension_numbers<[1], [0], [0], [1], [0, 0, 1, 1], [], []>} : vector<16x16xbf16>, vector<16x32xbf16>, vector<16x32xf32> -> vector<16x32xf32>
    %267 = arith.addf %241, %266 : vector<16x32xf32>
    %268 = vector.broadcast %204 : vector<1x32xf32> to vector<16x32xf32>
    %269 = arith.addf %267, %268 : vector<16x32xf32>
    %270 = arith.addf %194, %269 : vector<16x32xf32>
    %cst_95 = arith.constant dense<0.000000e+00> : vector<16xf32>
    %271 = vector.multi_reduction <add>, %270, %cst_95 [1] : vector<16x32xf32> to vector<16xf32>
    %272 = vector.shape_cast %271 : vector<16xf32> to vector<16x1xf32>
    %cst_96 = arith.constant 3.200000e+01 : f32
    %273 = vector.broadcast %cst_96 : f32 to vector<16x1xf32>
    %274 = arith.divf %272, %273 : vector<16x1xf32>
    %275 = vector.broadcast %274 : vector<16x1xf32> to vector<16x32xf32>
    %276 = arith.subf %270, %275 : vector<16x32xf32>
    %277 = arith.mulf %276, %276 : vector<16x32xf32>
    %cst_97 = arith.constant dense<0.000000e+00> : vector<16xf32>
    %278 = vector.multi_reduction <add>, %277, %cst_97 [1] : vector<16x32xf32> to vector<16xf32>
    %279 = vector.shape_cast %278 : vector<16xf32> to vector<16x1xf32>
    %cst_98 = arith.constant 3.200000e+01 : f32
    %280 = vector.broadcast %cst_98 : f32 to vector<16x1xf32>
    %281 = arith.divf %279, %280 : vector<16x1xf32>
    %282 = vector.broadcast %274 : vector<16x1xf32> to vector<16x32xf32>
    %283 = arith.subf %270, %282 : vector<16x32xf32>
    %cst_99 = arith.constant 9.99999996E-13 : f32
    %284 = vector.broadcast %cst_99 : f32 to vector<16x1xf32>
    %285 = arith.addf %281, %284 : vector<16x1xf32>
    %286 = math.rsqrt %285 : vector<16x1xf32>
    %287 = vector.broadcast %286 : vector<16x1xf32> to vector<16x32xf32>
    %288 = arith.mulf %283, %287 : vector<16x32xf32>
    %289 = vector.broadcast %205 : vector<1x32xf32> to vector<16x32xf32>
    %290 = arith.mulf %288, %289 : vector<16x32xf32>
    %291 = vector.broadcast %206 : vector<1x32xf32> to vector<16x32xf32>
    %292 = arith.addf %290, %291 : vector<16x32xf32>
    %293 = arith.truncf %292 : vector<16x32xf32> to vector<16x32xbf16>
    %cst_100 = arith.constant dense<0.000000e+00> : vector<16x128xf32>
    %294 = tpu.matmul %293, %200, %cst_100 {dimension_numbers = #tpu.dot_dimension_numbers<[1], [0], [0], [1], [0, 0, 1, 1], [], []>} : vector<16x32xbf16>, vector<32x128xbf16>, vector<16x128xf32> -> vector<16x128xf32>
    %295 = vector.broadcast %207 : vector<1x128xf32> to vector<16x128xf32>
    %296 = arith.addf %294, %295 : vector<16x128xf32>
    %297 = arith.mulf %296, %296 : vector<16x128xf32>
    %298 = arith.mulf %296, %297 : vector<16x128xf32>
    %cst_101 = arith.constant 4.471500e-02 : f32
    %299 = vector.broadcast %cst_101 : f32 to vector<16x128xf32>
    %300 = arith.mulf %299, %298 : vector<16x128xf32>
    %301 = arith.addf %296, %300 : vector<16x128xf32>
    %cst_102 = arith.constant 0.797884583 : f32
    %302 = vector.broadcast %cst_102 : f32 to vector<16x128xf32>
    %303 = arith.mulf %302, %301 : vector<16x128xf32>
    %304 = math.tanh %303 : vector<16x128xf32>
    %cst_103 = arith.constant 1.000000e+00 : f32
    %305 = vector.broadcast %cst_103 : f32 to vector<16x128xf32>
    %306 = arith.addf %305, %304 : vector<16x128xf32>
    %cst_104 = arith.constant 5.000000e-01 : f32
    %307 = vector.broadcast %cst_104 : f32 to vector<16x128xf32>
    %308 = arith.mulf %307, %306 : vector<16x128xf32>
    %309 = arith.mulf %296, %308 : vector<16x128xf32>
    %310 = arith.truncf %309 : vector<16x128xf32> to vector<16x128xbf16>
    %cst_105 = arith.constant dense<0.000000e+00> : vector<16x32xf32>
    %311 = tpu.matmul %310, %202, %cst_105 {dimension_numbers = #tpu.dot_dimension_numbers<[1], [0], [0], [1], [0, 0, 1, 1], [], []>} : vector<16x128xbf16>, vector<128x32xbf16>, vector<16x32xf32> -> vector<16x32xf32>
    %312 = vector.broadcast %208 : vector<1x32xf32> to vector<16x32xf32>
    %313 = arith.addf %311, %312 : vector<16x32xf32>
    %314 = arith.addf %292, %313 : vector<16x32xf32>
    %cst_106 = arith.constant dense<0.000000e+00> : vector<16xf32>
    %315 = vector.multi_reduction <add>, %314, %cst_106 [1] : vector<16x32xf32> to vector<16xf32>
    %316 = vector.shape_cast %315 : vector<16xf32> to vector<16x1xf32>
    %cst_107 = arith.constant 3.200000e+01 : f32
    %317 = vector.broadcast %cst_107 : f32 to vector<16x1xf32>
    %318 = arith.divf %316, %317 : vector<16x1xf32>
    %319 = vector.broadcast %318 : vector<16x1xf32> to vector<16x32xf32>
    %320 = arith.subf %314, %319 : vector<16x32xf32>
    %321 = arith.mulf %320, %320 : vector<16x32xf32>
    %cst_108 = arith.constant dense<0.000000e+00> : vector<16xf32>
    %322 = vector.multi_reduction <add>, %321, %cst_108 [1] : vector<16x32xf32> to vector<16xf32>
    %323 = vector.shape_cast %322 : vector<16xf32> to vector<16x1xf32>
    %cst_109 = arith.constant 3.200000e+01 : f32
    %324 = vector.broadcast %cst_109 : f32 to vector<16x1xf32>
    %325 = arith.divf %323, %324 : vector<16x1xf32>
    %326 = vector.broadcast %318 : vector<16x1xf32> to vector<16x32xf32>
    %327 = arith.subf %314, %326 : vector<16x32xf32>
    %cst_110 = arith.constant 9.99999996E-13 : f32
    %328 = vector.broadcast %cst_110 : f32 to vector<16x1xf32>
    %329 = arith.addf %325, %328 : vector<16x1xf32>
    %330 = math.rsqrt %329 : vector<16x1xf32>
    %331 = vector.broadcast %330 : vector<16x1xf32> to vector<16x32xf32>
    %332 = arith.mulf %327, %331 : vector<16x32xf32>
    %333 = vector.broadcast %209 : vector<1x32xf32> to vector<16x32xf32>
    %334 = arith.mulf %332, %333 : vector<16x32xf32>
    %335 = vector.broadcast %210 : vector<1x32xf32> to vector<16x32xf32>
    %336 = arith.addf %334, %335 : vector<16x32xf32>
    %337 = tpu.iota {dimensions = array<i32: 1>} : vector<2x16xi32>
    %338 = tpu.iota {dimensions = array<i32: 0>} : vector<2x16xi32>
    %c8_i32 = arith.constant 8 : i32
    %339 = vector.broadcast %c8_i32 : i32 to vector<2x16xi32>
    %340 = arith.muli %338, %339 : vector<2x16xi32>
    %341 = arith.cmpi eq, %337, %340 : vector<2x16xi32>
    %cst_111 = arith.constant 1.000000e+00 : f32
    %cst_112 = arith.constant 0.000000e+00 : f32
    %342 = vector.broadcast %cst_111 : f32 to vector<2x16xf32>
    %343 = vector.broadcast %cst_112 : f32 to vector<2x16xf32>
    %344 = arith.select %341, %342, %343 : vector<2x16xi1>, vector<2x16xf32>
    %cst_113 = arith.constant dense<0.000000e+00> : vector<2x32xf32>
    %345 = tpu.matmul %344, %336, %cst_113 {dimension_numbers = #tpu.dot_dimension_numbers<[1], [0], [0], [1], [0, 0, 1, 1], [], []>} : vector<2x16xf32>, vector<16x32xf32>, vector<2x32xf32> -> vector<2x32xf32>
    %346 = arith.truncf %345 : vector<2x32xf32> to vector<2x32xbf16>
    %c0_114 = arith.constant 0 : index
    %c0_115 = arith.constant 0 : index
    %347 = vector.load %arg7[%c0_114, %c0_115] : memref<32x4xbf16, #tpu.memory_space<vmem>>, vector<32x4xbf16>
    %cst_116 = arith.constant dense<0.000000e+00> : vector<2x4xf32>
    %348 = tpu.matmul %346, %347, %cst_116 {dimension_numbers = #tpu.dot_dimension_numbers<[1], [0], [0], [1], [0, 0, 1, 1], [], []>} : vector<2x32xbf16>, vector<32x4xbf16>, vector<2x4xf32> -> vector<2x4xf32>
    %c18 = arith.constant 18 : index
    %c0_117 = arith.constant 0 : index
    %349 = vector.load %arg3[%c18, %c0_117] : memref<19x128xf32, #tpu.memory_space<vmem>>, vector<1x4xf32>
    %350 = vector.broadcast %349 : vector<1x4xf32> to vector<2x4xf32>
    %351 = arith.addf %348, %350 : vector<2x4xf32>
    %c0_118 = arith.constant 0 : index
    %c0_119 = arith.constant 0 : index
    %352 = vector.load %arg8[%c0_118, %c0_119] : memref<2x4xf32, #tpu.memory_space<vmem>>, vector<2x4xf32>
    tpu.vector_store %arg8[%c0_118, %c0_119], %351 {strides = array<i32>} : memref<2x4xf32, #tpu.memory_space<vmem>>, vector<2x4xf32>,
    return
  }
}

</mosaic_0001>

<bundles_post_ra>
// kernel: tpu_custom_call.1
= control target key start
LH: loop header
LB: loop body
LE: loop exit
PB: predicated region body
PF: predicated region fallthrough
CT: control target
= control target key end

     0   :  { %v3197_v2 = vmov 0   ;;  %v3198_v14 = vmov 0.0   ;;  %s3758_s0 = inlined_call_operand.vmem [shape: s32[16,1], index: 0, kind: input, shape index: {}]   ;;  %s3759_s1 = inlined_call_operand.vmem [shape: s32[2,8], index: 1, kind: input, shape index: {}]   ;;  %s3760_s2 = inlined_call_operand.vmem [shape: f32[118,32], index: 2, kind: input, shape index: {}]   ;;  %s3761_s3 = inlined_call_operand.vmem [shape: f32[19,128], index: 3, kind: input, shape index: {}]   ;;  %s3762_s4 = inlined_call_operand.vmem [shape: bf16[2,32,128], index: 4, kind: input, shape index: {}]   ;;  %s3763_s5 = inlined_call_operand.vmem [shape: bf16[2,32,128], index: 5, kind: input, shape index: {}]   ;;  %s3764_s6 = inlined_call_operand.vmem [shape: bf16[2,128,32], index: 6, kind: input, shape index: {}]   ;;  %s3765_s7 = inlined_call_operand.vmem [shape: bf16[32,4], index: 7, kind: input, shape index: {}]   ;;  %s3766_s8 = inlined_call_operand.hbm [shape: f32[2,4], index: 8, kind: output, shape index: {}]  }
   0x1   :  { %v33_v0 = vld [vmem:[%s3758_s0] sm:$0xff]  ;;  %3086 = vset.pattern.permute.xlu0 %v3197_v2  ;;  %v60_v3 = vld [vmem:[%s3760_s2 + $0x8] sm:$0xff]  ;;  %v61_v4 = vld [vmem:[%s3760_s2 + $0x10] sm:$0xff]  ;;  %2852 = vmatprep.subr.bf16.mxu1 %v3198_v14 }
   0x2   :  { %v59_v1 = vld [vmem:[%s3760_s2] sm:$0xff]  ;;  %v62_v5 = vld [vmem:[%s3760_s2 + $0x18] sm:$0xff]  ;;  %41 = vperm.xlu0 %3086, %v33_v0   ;;  %v34_v8 = vld [vmem:[%s3758_s0 + $0x8] sm:$0xff] }
   0x3   :  { %v3043_v6 = vpack.c.bf16 %v60_v3, %v59_v1  ;;  %v3047_v7 = vpack.c.bf16 %v62_v5, %v61_v4  ;;  %v63_v9 = vld [vmem:[%s3760_s2 + $0x20] sm:$0xff]  ;;  %v64_v10 = vld [vmem:[%s3760_s2 + $0x28] sm:$0xff]  ;;  %v65_v12 = vld [vmem:[%s3760_s2 + $0x30] sm:$0xff] }
   0x4   :  { %v3051_v11 = vpack.c.bf16 %v64_v10, %v63_v9  ;;  %v66_v13 = vld [vmem:[%s3760_s2 + $0x38] sm:$0xff]  ;;  %v67_v15 = vld [vmem:[%s3760_s2 + $0x40] sm:$0xff]  ;;  %v68_v16 = vld [vmem:[%s3760_s2 + $0x48] sm:$0xff] }
   0x5   :  { %3044 = vmatprep.subr.bf16.mxu0 %v3043_v6  ;;  %v3055_v17 = vpack.c.bf16 %v66_v13, %v65_v12  ;;  %v69_v18 = vld [vmem:[%s3760_s2 + $0x50] sm:$0xff]  ;;  %v70_v19 = vld [vmem:[%s3760_s2 + $0x58] sm:$0xff]  ;;  %v3059_v20 = vpack.c.bf16 %v68_v16, %v67_v15  ;;  %v71_v21 = vld [vmem:[%s3760_s2 + $0x60] sm:$0xff] }
   0x6   :  { %3046 = vmatpush3.bf16.msra.mxu0 %v3043_v6  ;;  %44 = vperm.xlu0 %3086, %v34_v8   ;;  %v72_v22 = vld [vmem:[%s3760_s2 + $0x68] sm:$0xff]  ;;  %v3063_v23 = vpack.c.bf16 %v70_v19, %v69_v18 }
   0x7   :  { %3048 = vmatprep.subr.bf16.mxu0 %v3047_v7  ;;  %v3067_v24 = vpack.c.bf16 %v72_v22, %v71_v21 }
   0xa   :  { %3050 = vmatpush3.bf16.msra.mxu0 %v3047_v7 }
   0xb   :  { %3052 = vmatprep.subr.bf16.mxu0 %v3051_v11 }
   0xe   :  { %3054 = vmatpush3.bf16.msra.mxu0 %v3051_v11 }
   0xf   :  { %3056 = vmatprep.subr.bf16.mxu0 %v3055_v17 }
  0x12   :  { %3058 = vmatpush3.bf16.msra.mxu0 %v3055_v17 }
  0x13   :  { %3060 = vmatprep.subr.bf16.mxu0 %v3059_v20 }
  0x16   :  { %3062 = vmatpush3.bf16.msra.mxu0 %v3059_v20 }
  0x17   :  { %3064 = vmatprep.subr.bf16.mxu0 %v3063_v23 }
  0x18   :  { %13 = vsyncpa [#allocation3], 0  ;;  %v73_v25 = vld [vmem:[%s3760_s2 + $0x70] sm:$0x3f]  ;;  %vm81_vm0 = vcmask 1045504   ;;  %v31_v26 = vlaneseq  ;;  %vm74_vm5 = vcmask 965632  }
  0x19   :  { %vm162_vm11 = vcmask 261120   ;;  %v3327_v52 = vld [vmem:[%s3762_s4] sm:$0xff]   ;;  %v3333_v53 = vld [vmem:[%s3762_s4 + $0x8] sm:$0xff]   ;;  %vm3199_vm12 = vmmov 0   ;;  %s3200_s0 = smov 64   ;;  %s3201_s25 = smov 96  }
  0x1a   :  { %3066 = vmatpush3.bf16.msra.mxu0 %v3063_v23  ;;  %v3307_v27 = vshrl.u32 %v31_v26, 7  ;;  %v3311_v30 = vand.u32 127, %v31_v26  ;;  %2853 = vmatpush3.bf16.msra.mxu1 %v3327_v52  ;;  %v2623_v62 = vld [vmem:[%s3761_s3] ss:$0 sm:$0xff]  ;;  %v2624_v2 = vld [vmem:[%s3761_s3 + $0x1] ss:$0 sm:$0xff] }
  0x1b   :  { %3068 = vmatprep.subr.bf16.mxu0 %v3067_v24  ;;  %2856 = vmatprep.mubr.msk.bf16.mxu1 %vm3199_vm12, %v3198_v14  ;;  %v2625_v7 = vld [vmem:[%s3761_s3 + $0x2] ss:$0 sm:$0xff]  ;;  %vm336_vm13 = vcmask 130048   ;;  %v3202_v20 = vmov 1966171168   ;;  %vm490_vm15 = vcmask 64512  }
  0x1c   :  { %v38_v28 = vand.u32 7, %v3307_v27  ;;  %v37_v29 = vadd.s32 8, %v3307_v27  ;;  %vm54_vm2 = vcmp.eq.s32.totalorder %v3311_v30, 116  ;;  %2854 = vmatprep.subr.bf16.mxu1 %v3198_v14  ;;  %v207_v21 = vunpack.c.l.s4 %v3202_v20  ;;  %v202_v22 = vld [vmem:[%s3759_s1] sm:$0x3]  ;;  %s3203_s1 = smov 80  }
  0x1d   :  { %vm203_vm14 = vcmp.eq.s32.totalorder %v202_v22, 0  ;;  %s3204_s28 = smov 112   ;;  %s3205_s29 = smov 48  }
  0x1e   :  { %3070 = vmatpush3.bf16.msra.mxu0 %v3067_v24  ;;  %v48_v31 = vadd.s32 100, %v38_v28  ;;  %v39_v32 = vand.u32 7, %v37_v29  ;;  %2855 = vmatpush3.bf16.msra.mxu1 %v3333_v53  ;;  %v208_v23 = vunpack.c.0.s8 %v207_v21  ;;  %v230_v29 = vsub.s32 0, %v3307_v27  ;;  %s3206_s30 = smov 32   ;;  %s3208_s15 = smov [#allocation2]  }
  0x1f   :  { %2847 = vmatprep.subr.msk.mxu0 %vm81_vm0, %v73_v25  ;;  %2860 = vmatprep.subr.mxu1 %v3198_v14  ;;  %s2612_s2 = sshll.u32 %s3208_s15, 4  ;;  %s2613_s2 = int_to_ptr.vmem [resolvable:$true] %s2612_s2 }
  0x20   :  { %vm50_vm1 = vcmp.eq.s32.totalorder %v3311_v30, %v48_v31  ;;  %v49_v33 = vadd.s32 100, %v39_v32  ;;  %v211_v24 = vsub.s32 %v208_v23, %v3307_v27  ;;  %p3178_p1 = scmp.lt.s32.totalorder %s2613_s2, %s2613_s2 }
  0x22   :  { %2848 = vmatpush3.msk.msra.mxu0 %vm81_vm0, %v73_v25  ;;  %vm51_vm6 = vcmp.eq.s32.totalorder %v3311_v30, %v49_v33  ;;  %v204_v25 = vsel %vm203_vm14, -1e+09, %v3198_v14 }
  0x23   :  { %2895 = vmatprep.subr.mxu0 %v3198_v14  ;;  %v212_v26 = vrot.slane %v204_v25, %v211_v24 }
  0x25   :  { %v220_v28 = vrot.slane %v212_v26, %v211_v24  ;;  %v213_v31 = vcombine.high %v212_v26, %v212_v26 }
  0x27   :  { %v3389_v32 = vrot.slane %v220_v28, %v230_v29  ;;  %v227_v33 = vrot.slane %v213_v31, %v211_v24 }
  0x81   :  { %v42_v34 = vpop.permute.xlu0 %41 }
  0x82   :  { %vm46_vm3 = vcmp.eq.s32.totalorder %v3311_v30, %v42_v34 }
  0x83   :  { %vm52_vm4 = vmor %vm46_vm3, %vm50_vm1  ;;  %vm2604_vm1 = vcmask 25600  }
  0x84   :  { %vm55_vm7 = vmor %vm52_vm4, %vm54_vm2 }
  0x85   :  { %v45_v35 = vpop.permute.xlu0 %44  ;;  %v57_v36 = vsel %vm55_vm7, 1.0, %v3198_v14 }
  0x86   :  { %vm47_vm8 = vcmp.eq.s32.totalorder %v3311_v30, %v45_v35  ;;  %2849 = vmatprep.mubr.msk.f32.mxu0 %vm74_vm5, %v57_v36 }
  0x87   :  { %vm53_vm9 = vmor %vm47_vm8, %vm51_vm6 }
  0x88   :  { %vm56_vm10 = vmor %vm53_vm9, %vm54_vm2 }
  0x89   :  { %v58_v37 = vsel %vm56_vm10, 1.0, %v3198_v14 }
  0x8a   :  { %2850 = vmatmul.mubr.msk.f32.vlgmr.msra.gmra.mrb[0].mxu0 %vm74_vm5, %v58_v37  ;;  %v3392_v37 = vrot.slane %v227_v33, %v230_v29 }
  0x8b   :  { %2897 = vmatprep.mubr.msk.f32.mxu0 %vm3199_vm12, %v3198_v14 }
 0x15d   :  { %v2851_v38 = vpop.f32.mrb[0].mxu0 }
 0x15e   :  { %v151_v39 = vpop.f32.mrb[1].mxu0  ;;  %v166_v41 = vsel %vm162_vm11, %v2851_v38, 0.0 }
 0x15f   :  { %v163_v40 = vsel %vm162_vm11, %v151_v39, 0.0 }
 0x160   :  { %164 = vadd.xlane.f32.xlu1 %v163_v40 }
 0x164   :  { %167 = vadd.xlane.f32.xlu1 %v166_v41 }
 0x1ed   :  { %v165_v42 = vpop.xlane.xlu1 %164 }
 0x1ee   :  { %v170_v43 = vmul.f32 0.03125, %v165_v42 }
 0x1f0   :  { %v172_v44 = vsub.f32 %v151_v39, %v170_v43 }
 0x1f1   :  { %v168_v45 = vpop.xlane.xlu1 %167 }
 0x1f2   :  { %v171_v46 = vmul.f32 0.03125, %v168_v45  ;;  %v174_v47 = vmul.f32 %v172_v44, %v172_v44 }
 0x1f4   :  { %v173_v48 = vsub.f32 %v2851_v38, %v171_v46  ;;  %v176_v49 = vsel %vm162_vm11, %v174_v47, 0.0 }
 0x1f5   :  { %177 = vadd.xlane.f32.xlu0 %v176_v49 }
 0x1f6   :  { %v175_v50 = vmul.f32 %v173_v48, %v173_v48 }
 0x1f8   :  { %v179_v51 = vsel %vm162_vm11, %v175_v50, 0.0 }
 0x1f9   :  { %180 = vadd.xlane.f32.xlu1 %v179_v51 }
 0x282   :  { %v178_v54 = vpop.xlane.xlu0 %177 }
 0x283   :  { %v182_v55 = vmul.f32 0.03125, %v178_v54 }
 0x285   :  { %v184_v56 = vadd.f32 1e-12, %v182_v55 }
 0x286   :  { %v181_v57 = vpop.xlane.xlu1 %180 }
 0x287   :  { %3113 = vrsqrt.f32 %v184_v56  ;;  %v183_v58 = vmul.f32 0.03125, %v181_v57 }
 0x289   :  { %v185_v59 = vadd.f32 1e-12, %v183_v58 }
 0x28b   :  { %3115 = vrsqrt.f32 %v185_v59 }
 0x291   :  { %v3114_v60 = vpop.eup %3113 }
 0x292   :  { %v188_v61 = vmul.f32 %v3114_v60, %v172_v44 }
 0x294   :  { %v194_v1 = vmul.f32 %v2623_v62, %v188_v61 }
 0x295   :  { %v3116_v63 = vpop.eup %3115 }
 0x296   :  { %v189_v0 = vmul.f32 %v3116_v63, %v173_v48  ;;  %v3348_v4 = vadd.f32 %v2624_v2, %v194_v1 }
 0x298   :  { %v195_v3 = vmul.f32 %v2623_v62, %v189_v0 }
 0x29a   :  { %v3350_v5 = vadd.f32 %v2624_v2, %v195_v3 }
 0x29c   :  { %v270_v6 = vpack.c.bf16 %v3350_v5, %v3348_v4 }
 0x29e   :  { %2857 = vmatmul.mubr.msk.bf16.vlgmr.msra.gmra.mrb[0].mxu1 %vm162_vm11, %v270_v6 }
 0x29f   :  { %2862 = vmatprep.mubr.msk.f32.mxu1 %vm3199_vm12, %v3198_v14 }
 0x371   :  { %v324_v8 = vpop.f32.mrb[0].mxu1 }
 0x372   :  { %v3360_v9 = vadd.f32 %v2625_v7, %v324_v8  ;;  %v2858_v10 = vpop.f32.mrb[1].mxu1 }
 0x373   :  { %v327_v11 = vpop.f32.mrb[2].mxu1 }
 0x374   :  { %513 = vrot.lane.b32.xlu0 %v3360_v9, %s3200_s0  ;;  %334 = vrot.lane.b32.xlu1 %v3360_v9, %s3201_s25  ;;  %v2859_v12 = vpop.f32.mrb[3].mxu1  ;;  %v3366_v13 = vadd.f32 %v2625_v7, %v327_v11  ;;  %v331_v16 = vmul.f32 0.25, %v3360_v9 }
 0x376   :  { %v332_v18 = vmul.f32 0.25, %v3366_v13 }
 0x378   :  { %413 = vrot.lane.b32.xlu1 %v3366_v13, %s3201_s25 }
 0x3e6   :  { %v335_v15 = vpop.permute.xlu1 %334  ;;  %v514_v19 = vpop.permute.xlu0 %513 }
 0x3e7   :  { %2861 = vmatpush3.xpose.msk.msra.mxu1 %vm336_vm13, %v335_v15 }
 0x3e8   :  { %2865 = vmatprep.subr.mxu1 %v3198_v14 }
 0x3ea   :  { %2863 = vmatmul.mubr.msk.f32.vlgmr.msra.gmra.mrb[4].mxu1 %vm336_vm13, %v331_v16  ;;  %v414_v17 = vpop.permute.xlu1 %413 }
 0x3eb   :  { %2866 = vmatpush3.xpose.msk.msra.mxu1 %vm336_vm13, %v414_v17  ;;  %2867 = vmatprep.mubr.msk.f32.mxu1 %vm3199_vm12, %v3198_v14 }
 0x3ec   :  { %2870 = vmatprep.subr.mxu1 %v3198_v14 }
 0x3ee   :  { %2868 = vmatmul.mubr.msk.f32.vlgmr.msra.gmra.mrb[6].mxu1 %vm336_vm13, %v332_v18 }
 0x3ef   :  { %2871 = vmatpush3.msra.mxu1 %v514_v19  ;;  %2872 = vmatprep.mubr.msk.f32.mxu1 %vm3199_vm12, %v3198_v14 }
 0x3f0   :  { %2875 = vmatprep.subr.mxu1 %v3198_v14 }
 0x4bd   :  { %v408_v34 = vpop.f32.mrb[4].mxu1 }
 0x4be   :  { %v409_v35 = vadd.f32 %v408_v34, %v3389_v32  ;;  %v2864_v36 = vpop.f32.mrb[5].mxu1 }
 0x4c0   :  { %v491_v38 = vsel %vm490_vm15, %v409_v35, -inf }
 0x4c1   :  { %492 = vmax.xlane.f32.xlu1 %v491_v38  ;;  %v486_v39 = vpop.f32.mrb[6].mxu1 }
 0x4c2   :  { %v487_v40 = vadd.f32 %v486_v39, %v3392_v37  ;;  %v2869_v41 = vpop.f32.mrb[7].mxu1 }
 0x4c4   :  { %v494_v42 = vsel %vm490_vm15, %v487_v40, -inf }
 0x4c5   :  { %495 = vmax.xlane.f32.xlu0 %v494_v42 }
 0x4d2   :  { %589 = vrot.lane.b32.xlu1 %v3366_v13, %s3200_s0 }
 0x4db   :  { %668 = vrot.lane.b32.xlu0 %v3360_v9, %s3203_s1 }
 0x54e   :  { %v493_v43 = vpop.xlane.xlu1 %492 }
 0x54f   :  { %v497_v44 = vsub.f32 %v409_v35, %v493_v43 }
 0x551   :  { %v499_v45 = vmul.f32 1.442695, %v497_v44 }
 0x552   :  { %v496_v48 = vpop.xlane.xlu0 %495  ;;  %v590_v59 = vpop.permute.xlu1 %589 }
 0x553   :  { %3117 = vpow2.f32 %v499_v45  ;;  %v498_v49 = vsub.f32 %v487_v40, %v496_v48 }
 0x555   :  { %v501_v50 = vmul.f32 1.442695, %v498_v49  ;;  %v2643_v49 = vld [vmem:[%s3761_s3 + $0x3] ss:$0 sm:$0xff] }
 0x556   :  { %v669_v55 = vpop.permute.xlu0 %668 }
 0x557   :  { %3119 = vpow2.f32 %v501_v50 }
 0x55d   :  { %v3118_v46 = vpop.eup %3117 }
 0x55e   :  { %v503_v47 = vsel %vm490_vm15, %v3118_v46, 0.0 }
 0x55f   :  { %504 = vadd.xlane.f32.xlu0 %v503_v47 }
 0x561   :  { %v3120_v51 = vpop.eup %3119 }
 0x562   :  { %v506_v54 = vsel %vm490_vm15, %v3120_v51, 0.0 }
 0x575   :  { %666 = vrot.lane.b32.xlu0 %v331_v16, %s3204_s28 }
 0x594   :  { %507 = vadd.xlane.f32.xlu0 %v506_v54 }
 0x5aa   :  { %746 = vrot.lane.b32.xlu0 %v3366_v13, %s3203_s1 }
 0x5ae   :  { %744 = vrot.lane.b32.xlu0 %v332_v18, %s3204_s28 }
 0x5ec   :  { %v505_v56 = vpop.xlane.xlu0 %504 }
 0x5ed   :  { %3121 = vrcp.f32 %v505_v56 }
 0x5f0   :  { %v667_v60 = vpop.permute.xlu0 %666 }
 0x5f7   :  { %v3122_v57 = vpop.eup %3121 }
 0x5f8   :  { %v511_v58 = vmul.f32 %v3122_v57, %v3118_v46 }
 0x5fa   :  { %2873 = vmatmul.mubr.msk.f32.vlgmr.msra.gmra.mrb[8].mxu1 %vm490_vm15, %v511_v58 }
 0x5fb   :  { %2876 = vmatpush3.msra.mxu1 %v590_v59  ;;  %2877 = vmatprep.mubr.msk.f32.mxu1 %vm3199_vm12, %v3198_v14 }
 0x5fc   :  { %2880 = vmatprep.subr.mxu1 %v3198_v14 }
 0x621   :  { %v508_v61 = vpop.xlane.xlu0 %507 }
 0x622   :  { %3123 = vrcp.f32 %v508_v61 }
 0x625   :  { %v747_v0 = vpop.permute.xlu0 %746 }
 0x629   :  { %v745_v1 = vpop.permute.xlu0 %744 }
 0x62c   :  { %v3124_v62 = vpop.eup %3123 }
 0x62d   :  { %v512_v63 = vmul.f32 %v3124_v62, %v3120_v51 }
 0x62f   :  { %2878 = vmatmul.mubr.msk.f32.vlgmr.msra.gmra.mrb[10].mxu1 %vm490_vm15, %v512_v63 }
 0x630   :  { %2881 = vmatpush3.xpose.msk.msra.mxu1 %vm336_vm13, %v669_v55  ;;  %2882 = vmatprep.mubr.msk.f32.mxu1 %vm3199_vm12, %v3198_v14 }
 0x631   :  { %2885 = vmatprep.subr.mxu1 %v3198_v14 }
 0x633   :  { %2883 = vmatmul.mubr.msk.f32.vlgmr.msra.gmra.mrb[12].mxu1 %vm336_vm13, %v667_v60 }
 0x634   :  { %2886 = vmatpush3.xpose.msk.msra.mxu1 %vm336_vm13, %v747_v0  ;;  %2887 = vmatprep.mubr.msk.f32.mxu1 %vm3199_vm12, %v3198_v14 }
 0x635   :  { %2890 = vmatprep.subr.mxu1 %v3198_v14 }
 0x637   :  { %2888 = vmatmul.mubr.msk.f32.vlgmr.msra.gmra.mrb[14].mxu1 %vm336_vm13, %v745_v1 }
 0x638   :  { %2892 = vmatprep.mubr.msk.f32.mxu1 %vm3199_vm12, %v3198_v14 }
 0x6cd   :  { %v585_v2 = vpop.f32.mrb[8].mxu1 }
 0x6ce   :  { %v2874_v3 = vpop.f32.mrb[9].mxu1 }
 0x702   :  { %v661_v6 = vpop.f32.mrb[10].mxu1 }
 0x703   :  { %v665_v7 = vpack.c.bf16 %v661_v6, %v585_v2  ;;  %v2879_v8 = vpop.f32.mrb[11].mxu1 }
 0x706   :  { %v740_v10 = vpop.f32.mrb[12].mxu1 }
 0x707   :  { %v741_v11 = vadd.f32 %v740_v10, %v3389_v32  ;;  %v2884_v12 = vpop.f32.mrb[13].mxu1 }
 0x708   :  { %v3090_v12 = vld [vmem:[%s3763_s5 + $0x8] sm:$0xff]  }
 0x709   :  { %v822_v15 = vsel %vm490_vm15, %v741_v11, -inf }
 0x70a   :  { %823 = vmax.xlane.f32.xlu1 %v822_v15  ;;  %v818_v16 = vpop.f32.mrb[14].mxu1 }
 0x70b   :  { %v819_v17 = vadd.f32 %v818_v16, %v3392_v37  ;;  %v2889_v18 = vpop.f32.mrb[15].mxu1 }
 0x70d   :  { %v825_v19 = vsel %vm490_vm15, %v819_v17, -inf }
 0x70e   :  { %826 = vmax.xlane.f32.xlu0 %v825_v19 }
 0x797   :  { %v824_v20 = vpop.xlane.xlu1 %823 }
 0x798   :  { %v828_v21 = vsub.f32 %v741_v11, %v824_v20 }
 0x79a   :  { %v830_v22 = vmul.f32 1.442695, %v828_v21 }
 0x79b   :  { %v827_v23 = vpop.xlane.xlu0 %826 }
 0x79c   :  { %3125 = vpow2.f32 %v830_v22  ;;  %v829_v24 = vsub.f32 %v819_v17, %v827_v23  ;;  %v2644_v22 = vld [vmem:[%s3761_s3 + $0x4] ss:$0 sm:$0xff] }
 0x79e   :  { %v832_v25 = vmul.f32 1.442695, %v829_v24 }
 0x7a0   :  { %3127 = vpow2.f32 %v832_v25 }
 0x7a6   :  { %v3126_v26 = vpop.eup %3125 }
 0x7a7   :  { %v834_v28 = vsel %vm490_vm15, %v3126_v26, 0.0 }
 0x7a8   :  { %835 = vadd.xlane.f32.xlu0 %v834_v28  ;;  %v2645_v28 = vld [vmem:[%s3761_s3 + $0x5] ss:$0 sm:$0xff] }
 0x7aa   :  { %v3128_v29 = vpop.eup %3127 }
 0x7ab   :  { %v837_v31 = vsel %vm490_vm15, %v3128_v29, 0.0 }
 0x7ac   :  { %838 = vadd.xlane.f32.xlu1 %v837_v31 }
 0x7bd   :  { %920 = vrot.lane.b32.xlu1 %v3366_v13, %s3205_s29 }
 0x7be   :  { %844 = vrot.lane.b32.xlu0 %v3360_v9, %s3205_s29 }
 0x7c1   :  { %997 = vrot.lane.b32.xlu1 %v3333_v53, %s3206_s30 }
 0x7c2   :  { %1044 = vrot.lane.b32.xlu0 %v3327_v52, %s3206_s30 }
 0x835   :  { %v836_v33 = vpop.xlane.xlu0 %835 }
 0x836   :  { %3129 = vrcp.f32 %v836_v33 }
 0x839   :  { %v839_v34 = vpop.xlane.xlu1 %838  ;;  %v845_v35 = vpop.permute.xlu0 %844 }
 0x83a   :  { %3131 = vrcp.f32 %v839_v34  ;;  %2891 = vmatpush3.msra.mxu1 %v845_v35  ;;  %v3091_v35 = vld [vmem:[%s3764_s6] sm:$0xff]  }
 0x83b   :  { %2900 = vmatprep.subr.bf16.mxu1 %v3198_v14 }
 0x83d   :  { %v921_v36 = vpop.permute.xlu1 %920  ;;  %v1045_v38 = vpop.permute.xlu0 %1044 }
 0x83e   :  { %2896 = vmatpush3.msra.mxu0 %v921_v36  ;;  %v3092_v36 = vld [vmem:[%s3764_s6 + $0x8] sm:$0xff]  }
 0x83f   :  { %2906 = vmatprep.subr.bf16.mxu0 %v3198_v14 }
 0x840   :  { %v3130_v9 = vpop.eup %3129 }
 0x841   :  { %v842_v13 = vmul.f32 %v3130_v9, %v3126_v26  ;;  %v998_v39 = vpop.permute.xlu1 %997  ;;  %v3093_v9 = vld [vmem:[%s3764_s6 + $0x10] sm:$0xff]  }
 0x843   :  { %2893 = vmatmul.mubr.msk.f32.vlgmr.msra.gmra.mrb[16].mxu1 %vm490_vm15, %v842_v13  ;;  %v3094_v13 = vld [vmem:[%s3764_s6 + $0x18] sm:$0xff]  }
 0x844   :  { %v3132_v53 = vpop.eup %3131  ;;  %2902 = vmatprep.mubr.msk.bf16.mxu1 %vm3199_vm12, %v3198_v14  ;;  %2901 = vmatpush3.bf16.msra.mxu1 %v998_v39  ;;  %v3098_v39 = vld [vmem:[%s3764_s6 + $0x38] sm:$0xff]  }
 0x845   :  { %v843_v52 = vmul.f32 %v3132_v53, %v3128_v29  ;;  %2912 = vmatprep.subr.bf16.mxu1 %v3198_v14  ;;  %v3095_v53 = vld [vmem:[%s3764_s6 + $0x20] sm:$0xff]  }
 0x847   :  { %2898 = vmatmul.mubr.msk.f32.vlgmr.msra.gmra.mrb[2].mxu0 %vm490_vm15, %v843_v52  ;;  %v3096_v52 = vld [vmem:[%s3764_s6 + $0x28] sm:$0xff]  }
 0x848   :  { %2907 = vmatpush3.bf16.msra.mxu0 %v1045_v38  ;;  %2908 = vmatprep.mubr.msk.bf16.mxu0 %vm3199_vm12, %v3198_v14  ;;  %v3097_v38 = vld [vmem:[%s3764_s6 + $0x30] sm:$0xff]  }
 0x849   :  { %2920 = vmatprep.subr.bf16.mxu0 %v3198_v14 }
 0x84b   :  { %2909 = vmatmul.mubr.msk.bf16.vlgmr.msra.gmra.mrb[4].mxu0 %vm336_vm13, %v665_v7 }
 0x84c   :  { %2936 = vmatprep.mubr.msk.bf16.mxu0 %vm3199_vm12, %v3198_v14  ;;  %2921 = vmatpush3.bf16.msra.mxu0 %v3091_v35 }
 0x84d   :  { %2922 = vmatprep.subr.bf16.mxu0 %v3198_v14 }
 0x850   :  { %2923 = vmatpush3.bf16.msra.mxu0 %v3092_v36 }
 0x851   :  { %2924 = vmatprep.subr.bf16.mxu0 %v3198_v14 }
 0x854   :  { %2925 = vmatpush3.bf16.msra.mxu0 %v3093_v9 }
 0x855   :  { %2926 = vmatprep.subr.bf16.mxu0 %v3198_v14 }
 0x858   :  { %2927 = vmatpush3.bf16.msra.mxu0 %v3094_v13 }
 0x859   :  { %2928 = vmatprep.subr.bf16.mxu0 %v3198_v14 }
 0x85c   :  { %2929 = vmatpush3.bf16.msra.mxu0 %v3095_v53 }
 0x85d   :  { %2930 = vmatprep.subr.bf16.mxu0 %v3198_v14 }
 0x860   :  { %2931 = vmatpush3.bf16.msra.mxu0 %v3096_v52  ;;  %v2659_v52 = vld [vmem:[%s3761_s3 + $0x8] ss:$0 sm:$0xff] }
 0x861   :  { %2932 = vmatprep.subr.bf16.mxu0 %v3198_v14 }
 0x864   :  { %2933 = vmatpush3.bf16.msra.mxu0 %v3097_v38 }
 0x865   :  { %2934 = vmatprep.subr.bf16.mxu0 %v3198_v14 }
 0x868   :  { %2935 = vmatpush3.bf16.msra.mxu0 %v3098_v39 }
 0x869   :  { %2973 = vmatprep.subr.mxu0 %v3198_v14 }
 0x916   :  { %v916_v40 = vpop.f32.mrb[16].mxu1 }
 0x917   :  { %v2894_v41 = vpop.f32.mrb[17].mxu1 }
 0x91a   :  { %v992_v42 = vpop.f32.mrb[2].mxu0 }
 0x91b   :  { %v996_v43 = vpack.c.bf16 %v992_v42, %v916_v40  ;;  %v2899_v44 = vpop.f32.mrb[3].mxu0  ;;  %v2646_v40 = vld [vmem:[%s3761_s3 + $0x6] ss:$0 sm:$0xff] }
 0x91d   :  { %2903 = vmatmul.mubr.msk.bf16.vlgmr.msra.gmra.mrb[20].mxu1 %vm336_vm13, %v996_v43 }
 0x91e   :  { %v1084_v45 = vpop.f32.mrb[4].mxu0  ;;  %2916 = vmatprep.mubr.msk.bf16.mxu1 %vm3199_vm12, %v3198_v14 }
 0x91f   :  { %v2910_v46 = vpop.f32.mrb[5].mxu0 }
 0x920   :  { %v1087_v47 = vpop.f32.mrb[6].mxu0 }
 0x921   :  { %v2911_v48 = vpop.f32.mrb[7].mxu0 }
 0x9f0   :  { %v1037_v50 = vpop.f32.mrb[20].mxu1 }
 0x9f1   :  { %v1085_v51 = vadd.f32 %v1084_v45, %v1037_v50  ;;  %v2904_v54 = vpop.f32.mrb[21].mxu1 }
 0x9f2   :  { %v1040_v55 = vpop.f32.mrb[22].mxu1 }
 0x9f3   :  { %v1095_v56 = vadd.f32 %v2643_v49, %v1085_v51  ;;  %v1088_v57 = vadd.f32 %v1087_v47, %v1040_v55  ;;  %v2905_v58 = vpop.f32.mrb[23].mxu1 }
 0x9f5   :  { %v1096_v59 = vadd.f32 %v2643_v49, %v1088_v57  ;;  %v1097_v60 = vadd.f32 %v1095_v56, %v3348_v4 }
 0x9f7   :  { %v1099_v61 = vsel %vm162_vm11, %v1097_v60, 0.0  ;;  %v1098_v62 = vadd.f32 %v1096_v59, %v3350_v5  ;;  %v3089_v5 = vld [vmem:[%s3763_s5] sm:$0xff]  }
 0x9f8   :  { %1100 = vadd.xlane.f32.xlu1 %v1099_v61  ;;  %2913 = vmatpush3.bf16.msra.mxu1 %v3089_v5 }
 0x9f9   :  { %v1102_v63 = vsel %vm162_vm11, %v1098_v62, 0.0  ;;  %2914 = vmatprep.subr.bf16.mxu1 %v3198_v14 }
 0x9fa   :  { %1103 = vadd.xlane.f32.xlu0 %v1102_v63 }
 0x9fc   :  { %2915 = vmatpush3.bf16.msra.mxu1 %v3090_v12 }
 0x9fd   :  { %2940 = vmatprep.subr.bf16.mxu1 %v3198_v14 }
 0xa85   :  { %v1101_v0 = vpop.xlane.xlu1 %1100 }
 0xa86   :  { %v1105_v1 = vmul.f32 0.03125, %v1101_v0 }
 0xa87   :  { %v1104_v2 = vpop.xlane.xlu0 %1103 }
 0xa88   :  { %v1107_v3 = vsub.f32 %v1097_v60, %v1105_v1  ;;  %v1106_v6 = vmul.f32 0.03125, %v1104_v2 }
 0xa8a   :  { %v1108_v7 = vsub.f32 %v1098_v62, %v1106_v6  ;;  %v1109_v8 = vmul.f32 %v1107_v3, %v1107_v3  ;;  %v2650_v6 = vld [vmem:[%s3761_s3 + $0x7] ss:$0 sm:$0xff] }
 0xa8c   :  { %v1111_v10 = vsel %vm162_vm11, %v1109_v8, 0.0  ;;  %v1110_v11 = vmul.f32 %v1108_v7, %v1108_v7 }
 0xa8d   :  { %1112 = vadd.xlane.f32.xlu0 %v1111_v10 }
 0xa8e   :  { %v1114_v4 = vsel %vm162_vm11, %v1110_v11, 0.0 }
 0xa8f   :  { %1115 = vadd.xlane.f32.xlu1 %v1114_v4 }
 0xb1a   :  { %v1113_v15 = vpop.xlane.xlu0 %1112 }
 0xb1b   :  { %v1117_v16 = vmul.f32 0.03125, %v1113_v15 }
 0xb1c   :  { %v1116_v17 = vpop.xlane.xlu1 %1115 }
 0xb1d   :  { %v1119_v18 = vadd.f32 1e-12, %v1117_v16  ;;  %v1118_v19 = vmul.f32 0.03125, %v1116_v17 }
 0xb1f   :  { %3133 = vrsqrt.f32 %v1119_v18  ;;  %v1120_v20 = vadd.f32 1e-12, %v1118_v19 }
 0xb21   :  { %3135 = vrsqrt.f32 %v1120_v20 }
 0xb29   :  { %v3134_v21 = vpop.eup %3133 }
 0xb2a   :  { %v1123_v23 = vmul.f32 %v3134_v21, %v1107_v3 }
 0xb2b   :  { %v3136_v24 = vpop.eup %3135 }
 0xb2c   :  { %v1129_v25 = vmul.f32 %v2644_v22, %v1123_v23  ;;  %v1124_v26 = vmul.f32 %v3136_v24, %v1108_v7 }
 0xb2e   :  { %v1130_v29 = vmul.f32 %v2644_v22, %v1124_v26  ;;  %v3477_v31 = vadd.f32 %v2645_v28, %v1129_v25 }
 0xb30   :  { %v3479_v33 = vadd.f32 %v2645_v28, %v1130_v29  ;;  %v3535_v29 = vld [vmem:[%s3762_s4 + $0x10] sm:$0xff]  }
 0xb32   :  { %v1137_v34 = vpack.c.bf16 %v3479_v33, %v3477_v31 }
 0xb34   :  { %2917 = vmatmul.mubr.msk.bf16.vlgmr.msra.gmra.mrb[24].mxu1 %vm162_vm11, %v1137_v34 }
 0xb35   :  { %2944 = vmatprep.mubr.msk.bf16.mxu1 %vm3199_vm12, %v3198_v14  ;;  %2941 = vmatpush3.bf16.msra.mxu1 %v3535_v29 }
 0xb36   :  { %2942 = vmatprep.subr.bf16.mxu1 %v3198_v14 }
 0xc07   :  { %v1191_v41 = vpop.f32.mrb[24].mxu1 }
 0xc08   :  { %v1192_v42 = vadd.f32 %v2646_v40, %v1191_v41  ;;  %v2918_v43 = vpop.f32.mrb[25].mxu1 }
 0xc09   :  { %v1194_v44 = vpop.f32.mrb[26].mxu1 }
 0xc0a   :  { %v1198_v45 = vmul.f32 %v1192_v42, %v1192_v42  ;;  %v1195_v46 = vadd.f32 %v2646_v40, %v1194_v44  ;;  %v2919_v47 = vpop.f32.mrb[27].mxu1 }
 0xc0b   :  { %v2685_v47 = vld [vmem:[%s3761_s3 + $0xa] ss:$0 sm:$0xff] }
 0xc0c   :  { %v1200_v48 = vmul.f32 %v1198_v45, %v1192_v42  ;;  %v1199_v49 = vmul.f32 %v1195_v46, %v1195_v46 }
 0xc0e   :  { %v1202_v50 = vmul.f32 0.044715, %v1200_v48  ;;  %v1201_v51 = vmul.f32 %v1199_v49, %v1195_v46 }
 0xc10   :  { %v1204_v54 = vadd.f32 %v1202_v50, %v1192_v42  ;;  %v1203_v55 = vmul.f32 0.044715, %v1201_v51 }
 0xc12   :  { %v1206_v56 = vmul.f32 0.7978846, %v1204_v54  ;;  %v1205_v57 = vadd.f32 %v1203_v55, %v1195_v46 }
 0xc14   :  { %3137 = vtanh.f32 %v1206_v56  ;;  %v1207_v58 = vmul.f32 0.7978846, %v1205_v57 }
 0xc16   :  { %3139 = vtanh.f32 %v1207_v58 }
 0xc1e   :  { %v3138_v59 = vpop.eup %3137 }
 0xc1f   :  { %v1210_v60 = vadd.f32 1.0, %v3138_v59 }
 0xc20   :  { %v3140_v61 = vpop.eup %3139 }
 0xc21   :  { %v1212_v62 = vmul.f32 0.5, %v1210_v60  ;;  %v1211_v63 = vadd.f32 1.0, %v3140_v61 }
 0xc23   :  { %v1213_v0 = vmul.f32 0.5, %v1211_v63  ;;  %v1214_v1 = vmul.f32 %v1212_v62, %v1192_v42  ;;  %v2660_v42 = vld [vmem:[%s3761_s3 + $0x9] ss:$0 sm:$0xff] }
 0xc25   :  { %v1215_v2 = vmul.f32 %v1213_v0, %v1195_v46 }
 0xc27   :  { %v1216_v3 = vpack.c.bf16 %v1215_v2, %v1214_v1 }
 0xc29   :  { %2937 = vmatmul.mubr.bf16.vlgmr.msra.gmra.mrb[8].mxu0 %v1216_v3 }
 0xc2a   :  { %2975 = vmatprep.mubr.msk.f32.mxu0 %vm3199_vm12, %v3198_v14 }
 0xcfc   :  { %v1303_v7 = vpop.f32.mrb[8].mxu0 }
 0xcfd   :  { %v1304_v8 = vadd.f32 %v2650_v6, %v1303_v7  ;;  %v2938_v10 = vpop.f32.mrb[9].mxu0 }
 0xcfe   :  { %v1306_v11 = vpop.f32.mrb[10].mxu0 }
 0xcff   :  { %v1307_v4 = vadd.f32 %v2650_v6, %v1306_v11  ;;  %v2939_v5 = vpop.f32.mrb[11].mxu0  ;;  %v1310_v12 = vadd.f32 %v1304_v8, %v3477_v31  ;;  %v3541_v31 = vld [vmem:[%s3762_s4 + $0x18] sm:$0xff]  }
 0xd00   :  { %2943 = vmatpush3.bf16.msra.mxu1 %v3541_v31 }
 0xd01   :  { %v1312_v15 = vsel %vm162_vm11, %v1310_v12, 0.0  ;;  %v1311_v16 = vadd.f32 %v1307_v4, %v3479_v33  ;;  %2948 = vmatprep.subr.mxu1 %v3198_v14 }
 0xd02   :  { %1313 = vadd.xlane.f32.xlu0 %v1312_v15 }
 0xd03   :  { %v1315_v17 = vsel %vm162_vm11, %v1311_v16, 0.0 }
 0xd04   :  { %1316 = vadd.xlane.f32.xlu1 %v1315_v17 }
 0xd8f   :  { %v1314_v18 = vpop.xlane.xlu0 %1313 }
 0xd90   :  { %v1318_v19 = vmul.f32 0.03125, %v1314_v18 }
 0xd91   :  { %v1317_v20 = vpop.xlane.xlu1 %1316 }
 0xd92   :  { %v1320_v21 = vsub.f32 %v1310_v12, %v1318_v19  ;;  %v1319_v22 = vmul.f32 0.03125, %v1317_v20 }
 0xd94   :  { %v1321_v23 = vsub.f32 %v1311_v16, %v1319_v22  ;;  %v1322_v24 = vmul.f32 %v1320_v21, %v1320_v21 }
 0xd96   :  { %v1324_v25 = vsel %vm162_vm11, %v1322_v24, 0.0  ;;  %v1323_v26 = vmul.f32 %v1321_v23, %v1321_v23 }
 0xd97   :  { %1325 = vadd.xlane.f32.xlu0 %v1324_v25 }
 0xd98   :  { %v1327_v28 = vsel %vm162_vm11, %v1323_v26, 0.0 }
 0xd99   :  { %1328 = vadd.xlane.f32.xlu1 %v1327_v28 }
 0xe24   :  { %v1326_v33 = vpop.xlane.xlu0 %1325 }
 0xe25   :  { %v1330_v34 = vmul.f32 0.03125, %v1326_v33 }
 0xe26   :  { %v1329_v35 = vpop.xlane.xlu1 %1328 }
 0xe27   :  { %v1332_v36 = vadd.f32 1e-12, %v1330_v34  ;;  %v1331_v9 = vmul.f32 0.03125, %v1329_v35 }
 0xe29   :  { %3141 = vrsqrt.f32 %v1332_v36  ;;  %v1333_v13 = vadd.f32 1e-12, %v1331_v9 }
 0xe2b   :  { %3143 = vrsqrt.f32 %v1333_v13 }
 0xe33   :  { %v3142_v53 = vpop.eup %3141 }
 0xe34   :  { %v1336_v38 = vmul.f32 %v3142_v53, %v1320_v21 }
 0xe35   :  { %v3144_v39 = vpop.eup %3143 }
 0xe36   :  { %v1342_v40 = vmul.f32 %v2659_v52, %v1336_v38  ;;  %v1337_v41 = vmul.f32 %v3144_v39, %v1321_v23 }
 0xe38   :  { %v1343_v43 = vmul.f32 %v2659_v52, %v1337_v41  ;;  %v3552_v44 = vadd.f32 %v2660_v42, %v1342_v40 }
 0xe3a   :  { %v3554_v45 = vadd.f32 %v2660_v42, %v1343_v43 }
 0xe3c   :  { %v1385_v46 = vpack.c.bf16 %v3554_v45, %v3552_v44 }
 0xe3e   :  { %2945 = vmatmul.mubr.msk.bf16.vlgmr.msra.gmra.mrb[28].mxu1 %vm162_vm11, %v1385_v46 }
 0xe3f   :  { %2950 = vmatprep.mubr.msk.f32.mxu1 %vm3199_vm12, %v3198_v14 }
 0xf11   :  { %v1439_v48 = vpop.f32.mrb[28].mxu1 }
 0xf12   :  { %v3564_v49 = vadd.f32 %v2685_v47, %v1439_v48  ;;  %v2946_v50 = vpop.f32.mrb[29].mxu1 }
 0xf13   :  { %v1442_v51 = vpop.f32.mrb[30].mxu1 }
 0xf14   :  { %v3566_v54 = vadd.f32 %v2685_v47, %v1442_v51  ;;  %1449 = vrot.lane.b32.xlu0 %v3564_v49, %s3201_s25  ;;  %v2947_v55 = vpop.f32.mrb[31].mxu1  ;;  %v1446_v57 = vmul.f32 0.25, %v3564_v49 }
 0xf16   :  { %1527 = vrot.lane.b32.xlu1 %v3566_v54, %s3201_s25  ;;  %v1447_v59 = vmul.f32 0.25, %v3566_v54 }
 0xf86   :  { %v1450_v56 = vpop.permute.xlu0 %1449 }
 0xf87   :  { %2949 = vmatpush3.xpose.msk.msra.mxu1 %vm336_vm13, %v1450_v56 }
 0xf88   :  { %2953 = vmatprep.subr.mxu1 %v3198_v14  ;;  %v1528_v58 = vpop.permute.xlu1 %1527 }
 0xf8a   :  { %2951 = vmatmul.mubr.msk.f32.vlgmr.msra.gmra.mrb[18].mxu1 %vm336_vm13, %v1446_v57 }
 0xf8b   :  { %2954 = vmatpush3.xpose.msk.msra.mxu1 %vm336_vm13, %v1528_v58  ;;  %2955 = vmatprep.mubr.msk.f32.mxu1 %vm3199_vm12, %v3198_v14 }
 0xf8c   :  { %2958 = vmatprep.subr.mxu1 %v3198_v14 }
 0xf8e   :  { %2956 = vmatmul.mubr.msk.f32.vlgmr.msra.gmra.mrb[32].mxu1 %vm336_vm13, %v1447_v59 }
 0xf8f   :  { %2960 = vmatprep.mubr.msk.f32.mxu1 %vm3199_vm12, %v3198_v14 }
0x105d   :  { %v1522_v60 = vpop.f32.mrb[18].mxu1 }
0x105e   :  { %v1523_v61 = vadd.f32 %v1522_v60, %v3389_v32  ;;  %v2952_v62 = vpop.f32.mrb[19].mxu1 }
0x1060   :  { %v1604_v63 = vsel %vm490_vm15, %v1523_v61, -inf }
0x1061   :  { %1605 = vmax.xlane.f32.xlu1 %v1604_v63  ;;  %v1600_v0 = vpop.f32.mrb[32].mxu1 }
0x1062   :  { %v1601_v1 = vadd.f32 %v1600_v0, %v3392_v37  ;;  %v2957_v2 = vpop.f32.mrb[33].mxu1 }
0x1064   :  { %v1607_v3 = vsel %vm490_vm15, %v1601_v1, -inf }
0x1065   :  { %1608 = vmax.xlane.f32.xlu0 %v1607_v3 }
0x1072   :  { %1702 = vrot.lane.b32.xlu1 %v3566_v54, %s3200_s0 }
0x1076   :  { %1781 = vrot.lane.b32.xlu1 %v3564_v49, %s3203_s1 }
0x10ee   :  { %v1606_v6 = vpop.xlane.xlu1 %1605 }
0x10ef   :  { %v1610_v7 = vsub.f32 %v1523_v61, %v1606_v6 }
0x10f1   :  { %v1612_v8 = vmul.f32 1.442695, %v1610_v7 }
0x10f2   :  { %v1609_v10 = vpop.xlane.xlu0 %1608  ;;  %v1703_v17 = vpop.permute.xlu1 %1702 }
0x10f3   :  { %3145 = vpow2.f32 %v1612_v8  ;;  %v1611_v11 = vsub.f32 %v1601_v1, %v1609_v10 }
0x10f5   :  { %v1614_v4 = vmul.f32 1.442695, %v1611_v11 }
0x10f6   :  { %v1782_v18 = vpop.permute.xlu1 %1781 }
0x10f7   :  { %3147 = vpow2.f32 %v1614_v4  ;;  %v2703_v4 = vld [vmem:[%s3761_s3 + $0xb] ss:$0 sm:$0xff] }
0x10fd   :  { %v3146_v5 = vpop.eup %3145 }
0x10fe   :  { %v1616_v12 = vsel %vm490_vm15, %v3146_v5, 0.0 }
0x10ff   :  { %1617 = vadd.xlane.f32.xlu0 %v1616_v12 }
0x1101   :  { %v3148_v15 = vpop.eup %3147 }
0x1102   :  { %v1619_v16 = vsel %vm490_vm15, %v3148_v15, 0.0 }
0x1103   :  { %1620 = vadd.xlane.f32.xlu1 %v1619_v16 }
0x1114   :  { %1779 = vrot.lane.b32.xlu1 %v1446_v57, %s3204_s28 }
0x1115   :  { %1626 = vrot.lane.b32.xlu0 %v3564_v49, %s3200_s0 }
0x1119   :  { %1859 = vrot.lane.b32.xlu0 %v3566_v54, %s3203_s1 }
0x111d   :  { %1857 = vrot.lane.b32.xlu0 %v1447_v59, %s3204_s28 }
0x118c   :  { %v1618_v19 = vpop.xlane.xlu0 %1617 }
0x118d   :  { %3149 = vrcp.f32 %v1618_v19 }
0x1190   :  { %v1621_v20 = vpop.xlane.xlu1 %1620  ;;  %v1627_v21 = vpop.permute.xlu0 %1626 }
0x1191   :  { %3151 = vrcp.f32 %v1621_v20  ;;  %2959 = vmatpush3.msra.mxu1 %v1627_v21 }
0x1192   :  { %2963 = vmatprep.subr.mxu1 %v3198_v14 }
0x1194   :  { %v1860_v22 = vpop.permute.xlu0 %1859  ;;  %v1780_v33 = vpop.permute.xlu1 %1779 }
0x1195   :  { %2974 = vmatpush3.xpose.msk.msra.mxu0 %vm336_vm13, %v1860_v22 }
0x1196   :  { %2983 = vmatprep.subr.mxu0 %v3198_v14 }
0x1197   :  { %v3150_v23 = vpop.eup %3149 }
0x1198   :  { %v1624_v24 = vmul.f32 %v3150_v23, %v3146_v5  ;;  %v1858_v25 = vpop.permute.xlu0 %1857 }
0x1199   :  { %2976 = vmatmul.mubr.msk.f32.vlgmr.msra.gmra.mrb[12].mxu0 %vm336_vm13, %v1858_v25 }
0x119a   :  { %2961 = vmatmul.mubr.msk.f32.vlgmr.msra.gmra.mrb[34].mxu1 %vm490_vm15, %v1624_v24  ;;  %2985 = vmatprep.mubr.msk.f32.mxu0 %vm3199_vm12, %v3198_v14 }
0x119b   :  { %v3152_v26 = vpop.eup %3151  ;;  %2964 = vmatpush3.msra.mxu1 %v1703_v17  ;;  %2965 = vmatprep.mubr.msk.f32.mxu1 %vm3199_vm12, %v3198_v14 }
0x119c   :  { %v1625_v28 = vmul.f32 %v3152_v26, %v3148_v15  ;;  %2968 = vmatprep.subr.mxu1 %v3198_v14 }
0x119e   :  { %2966 = vmatmul.mubr.msk.f32.vlgmr.msra.gmra.mrb[36].mxu1 %vm490_vm15, %v1625_v28 }
0x119f   :  { %2970 = vmatprep.mubr.msk.f32.mxu1 %vm3199_vm12, %v3198_v14 }
0x11a2   :  { %2969 = vmatpush3.xpose.msk.msra.mxu1 %vm336_vm13, %v1782_v18 }
0x11a3   :  { %2978 = vmatprep.subr.mxu1 %v3198_v14 }
0x11a5   :  { %2971 = vmatmul.mubr.msk.f32.vlgmr.msra.gmra.mrb[38].mxu1 %vm336_vm13, %v1780_v33 }
0x11a6   :  { %2980 = vmatprep.mubr.msk.f32.mxu1 %vm3199_vm12, %v3198_v14 }
0x126c   :  { %v1931_v34 = vpop.f32.mrb[12].mxu0 }
0x126d   :  { %v1932_v35 = vadd.f32 %v1931_v34, %v3392_v37  ;;  %v1698_v36 = vpop.f32.mrb[34].mxu1  ;;  %v2977_v9 = vpop.f32.mrb[13].mxu0 }
0x126e   :  { %v2962_v13 = vpop.f32.mrb[35].mxu1 }
0x126f   :  { %v1938_v53 = vsel %vm490_vm15, %v1932_v35, -inf }
0x1270   :  { %1939 = vmax.xlane.f32.xlu0 %v1938_v53  ;;  %v3102_v53 = vld [vmem:[%s3763_s5 + $0x18] sm:$0xff]  }
0x1271   :  { %v1774_v52 = vpop.f32.mrb[36].mxu1 }
0x1272   :  { %v1778_v38 = vpack.c.bf16 %v1774_v52, %v1698_v36  ;;  %v2967_v39 = vpop.f32.mrb[37].mxu1 }
0x1278   :  { %v1853_v40 = vpop.f32.mrb[38].mxu1 }
0x1279   :  { %v1854_v41 = vadd.f32 %v1853_v40, %v3389_v32  ;;  %v2972_v42 = vpop.f32.mrb[39].mxu1 }
0x127b   :  { %v1935_v43 = vsel %vm490_vm15, %v1854_v41, -inf }
0x127c   :  { %1936 = vmax.xlane.f32.xlu1 %v1935_v43 }
0x12fd   :  { %v1940_v46 = vpop.xlane.xlu0 %1939 }
0x12fe   :  { %v1942_v47 = vsub.f32 %v1932_v35, %v1940_v46  ;;  %v2704_v46 = vld [vmem:[%s3761_s3 + $0xc] ss:$0 sm:$0xff] }
0x1300   :  { %v1945_v48 = vmul.f32 1.442695, %v1942_v47 }
0x1302   :  { %3153 = vpow2.f32 %v1945_v48 }
0x1309   :  { %v1937_v37 = vpop.xlane.xlu1 %1936 }
0x130a   :  { %v1941_v50 = vsub.f32 %v1854_v41, %v1937_v37 }
0x130c   :  { %v3154_v51 = vpop.eup %3153  ;;  %v1943_v55 = vmul.f32 1.442695, %v1941_v50 }
0x130d   :  { %v1950_v56 = vsel %vm490_vm15, %v3154_v51, 0.0 }
0x130e   :  { %3155 = vpow2.f32 %v1943_v55  ;;  %1951 = vadd.xlane.f32.xlu1 %v1950_v56 }
0x1318   :  { %v3156_v57 = vpop.eup %3155 }
0x1319   :  { %v1947_v58 = vsel %vm490_vm15, %v3156_v57, 0.0 }
0x131a   :  { %1948 = vadd.xlane.f32.xlu0 %v1947_v58 }
0x131f   :  { %2033 = vrot.lane.b32.xlu1 %v3566_v54, %s3205_s29 }
0x1323   :  { %2110 = vrot.lane.b32.xlu1 %v3541_v31, %s3206_s30 }
0x1330   :  { %1957 = vrot.lane.b32.xlu0 %v3564_v49, %s3205_s29 }
0x1334   :  { %2157 = vrot.lane.b32.xlu0 %v3535_v29, %s3206_s30 }
0x139b   :  { %v1952_v32 = vpop.xlane.xlu1 %1951 }
0x139c   :  { %3157 = vrcp.f32 %v1952_v32  ;;  %v3103_v32 = vld [vmem:[%s3764_s6 + $0x40] sm:$0xff]  }
0x139f   :  { %v2034_v59 = vpop.permute.xlu1 %2033 }
0x13a0   :  { %2984 = vmatpush3.msra.mxu0 %v2034_v59  ;;  %v3104_v59 = vld [vmem:[%s3764_s6 + $0x48] sm:$0xff]  }
0x13a1   :  { %2994 = vmatprep.subr.bf16.mxu0 %v3198_v14 }
0x13a3   :  { %v2111_v63 = vpop.permute.xlu1 %2110 }
0x13a6   :  { %v3158_v60 = vpop.eup %3157 }
0x13a7   :  { %v1956_v61 = vmul.f32 %v3158_v60, %v3154_v51  ;;  %v1949_v62 = vpop.xlane.xlu0 %1948  ;;  %v2705_v51 = vld [vmem:[%s3761_s3 + $0xd] ss:$0 sm:$0xff]  ;;  %v3105_v60 = vld [vmem:[%s3764_s6 + $0x50] sm:$0xff]  }
0x13a8   :  { %3159 = vrcp.f32 %v1949_v62  ;;  %v3107_v62 = vld [vmem:[%s3764_s6 + $0x60] sm:$0xff]  }
0x13a9   :  { %2986 = vmatmul.mubr.msk.f32.vlgmr.msra.gmra.mrb[14].mxu0 %vm490_vm15, %v1956_v61  ;;  %v3106_v61 = vld [vmem:[%s3764_s6 + $0x58] sm:$0xff]  }
0x13aa   :  { %2996 = vmatprep.mubr.msk.bf16.mxu0 %vm3199_vm12, %v3198_v14 }
0x13ab   :  { %v1958_v31 = vpop.permute.xlu0 %1957 }
0x13ac   :  { %2979 = vmatpush3.msra.mxu1 %v1958_v31  ;;  %v3108_v31 = vld [vmem:[%s3764_s6 + $0x68] sm:$0xff]  }
0x13ad   :  { %2988 = vmatprep.subr.bf16.mxu1 %v3198_v14 }
0x13af   :  { %v2158_v29 = vpop.permute.xlu0 %2157 }
0x13b0   :  { %2995 = vmatpush3.bf16.msra.mxu0 %v2158_v29  ;;  %v3109_v29 = vld [vmem:[%s3764_s6 + $0x70] sm:$0xff]  }
0x13b1   :  { %3008 = vmatprep.subr.bf16.mxu0 %v3198_v14 }
0x13b2   :  { %v3160_v49 = vpop.eup %3159 }
0x13b3   :  { %v1955_v54 = vmul.f32 %v3160_v49, %v3156_v57  ;;  %2997 = vmatmul.mubr.msk.bf16.vlgmr.msra.gmra.mrb[16].mxu0 %vm336_vm13, %v1778_v38  ;;  %v3110_v49 = vld [vmem:[%s3764_s6 + $0x78] sm:$0xff]  }
0x13b4   :  { %3024 = vmatprep.mubr.msk.bf16.mxu0 %vm3199_vm12, %v3198_v14  ;;  %3009 = vmatpush3.bf16.msra.mxu0 %v3103_v32 }
0x13b5   :  { %2981 = vmatmul.mubr.msk.f32.vlgmr.msra.gmra.mrb[40].mxu1 %vm490_vm15, %v1955_v54  ;;  %3010 = vmatprep.subr.bf16.mxu0 %v3198_v14  ;;  %v2706_v54 = vld [vmem:[%s3761_s3 + $0xe] ss:$0 sm:$0xff] }
0x13b6   :  { %2990 = vmatprep.mubr.msk.bf16.mxu1 %vm3199_vm12, %v3198_v14  ;;  %2989 = vmatpush3.bf16.msra.mxu1 %v2111_v63 }
0x13b7   :  { %3000 = vmatprep.subr.bf16.mxu1 %v3198_v14 }
0x13b8   :  { %3011 = vmatpush3.bf16.msra.mxu0 %v3104_v59 }
0x13b9   :  { %3012 = vmatprep.subr.bf16.mxu0 %v3198_v14 }
0x13bc   :  { %3013 = vmatpush3.bf16.msra.mxu0 %v3105_v60  ;;  %v2719_v60 = vld [vmem:[%s3761_s3 + $0x10] ss:$0 sm:$0xff] }
0x13bd   :  { %3014 = vmatprep.subr.bf16.mxu0 %v3198_v14 }
0x13c0   :  { %3015 = vmatpush3.bf16.msra.mxu0 %v3106_v61 }
0x13c1   :  { %3016 = vmatprep.subr.bf16.mxu0 %v3198_v14 }
0x13c4   :  { %3017 = vmatpush3.bf16.msra.mxu0 %v3107_v62 }
0x13c5   :  { %3018 = vmatprep.subr.bf16.mxu0 %v3198_v14 }
0x13c8   :  { %3019 = vmatpush3.bf16.msra.mxu0 %v3108_v31 }
0x13c9   :  { %3020 = vmatprep.subr.bf16.mxu0 %v3198_v14 }
0x13cc   :  { %3021 = vmatpush3.bf16.msra.mxu0 %v3109_v29 }
0x13cd   :  { %3022 = vmatprep.subr.bf16.mxu0 %v3198_v14 }
0x13d0   :  { %3023 = vmatpush3.bf16.msra.mxu0 %v3110_v49  ;;  %v2720_v49 = vld [vmem:[%s3761_s3 + $0x11] ss:$0 sm:$0xff] }
0x147c   :  { %v2105_v0 = vpop.f32.mrb[14].mxu0 }
0x147d   :  { %v2987_v1 = vpop.f32.mrb[15].mxu0 }
0x1486   :  { %v2197_v2 = vpop.f32.mrb[16].mxu0 }
0x1487   :  { %v2998_v3 = vpop.f32.mrb[17].mxu0 }
0x1488   :  { %v2029_v6 = vpop.f32.mrb[40].mxu1  ;;  %v2200_v7 = vpop.f32.mrb[18].mxu0 }
0x1489   :  { %v2109_v8 = vpack.c.bf16 %v2105_v0, %v2029_v6  ;;  %v2982_v10 = vpop.f32.mrb[41].mxu1  ;;  %v2999_v11 = vpop.f32.mrb[19].mxu0 }
0x148b   :  { %2991 = vmatmul.mubr.msk.bf16.vlgmr.msra.gmra.mrb[44].mxu1 %vm336_vm13, %v2109_v8 }
0x148c   :  { %3004 = vmatprep.mubr.msk.bf16.mxu1 %vm3199_vm12, %v3198_v14 }
0x155e   :  { %v2150_v5 = vpop.f32.mrb[44].mxu1 }
0x155f   :  { %v2198_v12 = vadd.f32 %v2197_v2, %v2150_v5  ;;  %v2992_v15 = vpop.f32.mrb[45].mxu1 }
0x1560   :  { %v2153_v16 = vpop.f32.mrb[46].mxu1 }
0x1561   :  { %v2208_v17 = vadd.f32 %v2703_v4, %v2198_v12  ;;  %v2201_v18 = vadd.f32 %v2200_v7, %v2153_v16  ;;  %v2993_v19 = vpop.f32.mrb[47].mxu1 }
0x1563   :  { %v2209_v20 = vadd.f32 %v2703_v4, %v2201_v18  ;;  %v2210_v21 = vadd.f32 %v2208_v17, %v3552_v44 }
0x1565   :  { %v2212_v22 = vsel %vm162_vm11, %v2210_v21, 0.0  ;;  %v2211_v23 = vadd.f32 %v2209_v20, %v3554_v45  ;;  %v3101_v45 = vld [vmem:[%s3763_s5 + $0x10] sm:$0xff]  }
0x1566   :  { %2213 = vadd.xlane.f32.xlu1 %v2212_v22  ;;  %3001 = vmatpush3.bf16.msra.mxu1 %v3101_v45 }
0x1567   :  { %v2215_v24 = vsel %vm162_vm11, %v2211_v23, 0.0  ;;  %3002 = vmatprep.subr.bf16.mxu1 %v3198_v14 }
0x1568   :  { %2216 = vadd.xlane.f32.xlu0 %v2215_v24 }
0x156a   :  { %3003 = vmatpush3.bf16.msra.mxu1 %v3102_v53 }
0x15f3   :  { %v2214_v25 = vpop.xlane.xlu1 %2213 }
0x15f4   :  { %v2218_v26 = vmul.f32 0.03125, %v2214_v25 }
0x15f5   :  { %v2217_v28 = vpop.xlane.xlu0 %2216 }
0x15f6   :  { %v2220_v33 = vsub.f32 %v2210_v21, %v2218_v26  ;;  %v2219_v34 = vmul.f32 0.03125, %v2217_v28  ;;  %v2710_v28 = vld [vmem:[%s3761_s3 + $0xf] ss:$0 sm:$0xff] }
0x15f8   :  { %v2221_v35 = vsub.f32 %v2211_v23, %v2219_v34  ;;  %v2222_v36 = vmul.f32 %v2220_v33, %v2220_v33 }
0x15fa   :  { %v2224_v9 = vsel %vm162_vm11, %v2222_v36, 0.0  ;;  %v2223_v13 = vmul.f32 %v2221_v35, %v2221_v35 }
0x15fb   :  { %2225 = vadd.xlane.f32.xlu0 %v2224_v9 }
0x15fc   :  { %v2227_v44 = vsel %vm162_vm11, %v2223_v13, 0.0 }
0x15fd   :  { %2228 = vadd.xlane.f32.xlu1 %v2227_v44 }
0x1688   :  { %v2226_v52 = vpop.xlane.xlu0 %2225 }
0x1689   :  { %v2230_v38 = vmul.f32 0.03125, %v2226_v52 }
0x168a   :  { %v2229_v39 = vpop.xlane.xlu1 %2228 }
0x168b   :  { %v2232_v40 = vadd.f32 1e-12, %v2230_v38  ;;  %v2231_v41 = vmul.f32 0.03125, %v2229_v39 }
0x168d   :  { %3161 = vrsqrt.f32 %v2232_v40  ;;  %v2233_v42 = vadd.f32 1e-12, %v2231_v41 }
0x168f   :  { %3163 = vrsqrt.f32 %v2233_v42 }
0x1697   :  { %v3162_v43 = vpop.eup %3161 }
0x1698   :  { %v2236_v47 = vmul.f32 %v3162_v43, %v2220_v33 }
0x1699   :  { %v3164_v48 = vpop.eup %3163 }
0x169a   :  { %v2242_v37 = vmul.f32 %v2704_v46, %v2236_v47  ;;  %v2237_v50 = vmul.f32 %v3164_v48, %v2221_v35 }
0x169c   :  { %v2243_v55 = vmul.f32 %v2704_v46, %v2237_v50  ;;  %v3670_v56 = vadd.f32 %v2705_v51, %v2242_v37  ;;  %v3207_v50 = vmov 0.0|0.0  }
0x169d   :  { %3071 = vmatprep.subr.bf16.mxu1 %v3207_v50 }
0x169e   :  { %v3672_v57 = vadd.f32 %v2705_v51, %v2243_v55 }
0x16a0   :  { %v2250_v58 = vpack.c.bf16 %v3672_v57, %v3670_v56 }
0x16a2   :  { %3005 = vmatmul.mubr.msk.bf16.vlgmr.msra.gmra.mrb[48].mxu1 %vm162_vm11, %v2250_v58 }
0x16a3   :  { %3032 = vmatprep.mubr.msk.f32.mxu1 %vm3199_vm12, %v3198_v14 }
0x1775   :  { %v2304_v63 = vpop.f32.mrb[48].mxu1 }
0x1776   :  { %v2305_v0 = vadd.f32 %v2706_v54, %v2304_v63  ;;  %v3006_v1 = vpop.f32.mrb[49].mxu1 }
0x1777   :  { %v2307_v2 = vpop.f32.mrb[50].mxu1 }
0x1778   :  { %v2311_v3 = vmul.f32 %v2305_v0, %v2305_v0  ;;  %v2308_v6 = vadd.f32 %v2706_v54, %v2307_v2  ;;  %v3007_v7 = vpop.f32.mrb[51].mxu1  ;;  %v2463_v54 = vmul.u32 8, %v3307_v27  ;;  %v3112_v27 = vld [vmem:[%s3765_s7 + $0x8] sm:$0xff]  }
0x177a   :  { %v2313_v8 = vmul.f32 %v2311_v3, %v2305_v0  ;;  %v2312_v10 = vmul.f32 %v2308_v6, %v2308_v6  ;;  %vm2464_vm0 = vcmp.eq.s32.totalorder %v3311_v30, %v2463_v54 }
0x177b   :  { %v2465_v3 = vsel %vm2464_vm0, 1.0, %v3198_v14 }
0x177c   :  { %v2315_v11 = vmul.f32 0.044715, %v2313_v8  ;;  %v2314_v4 = vmul.f32 %v2312_v10, %v2308_v6  ;;  %v2722_v10 = vld [vmem:[%s3761_s3 + $0x12] ss:$0 sm:$0xff] }
0x177e   :  { %v2317_v5 = vadd.f32 %v2315_v11, %v2305_v0  ;;  %v2316_v12 = vmul.f32 0.044715, %v2314_v4 }
0x1780   :  { %v2319_v15 = vmul.f32 0.7978846, %v2317_v5  ;;  %v2318_v16 = vadd.f32 %v2316_v12, %v2308_v6 }
0x1782   :  { %3165 = vtanh.f32 %v2319_v15  ;;  %v2320_v17 = vmul.f32 0.7978846, %v2318_v16 }
0x1784   :  { %3167 = vtanh.f32 %v2320_v17 }
0x178c   :  { %v3166_v18 = vpop.eup %3165 }
0x178d   :  { %v2323_v19 = vadd.f32 1.0, %v3166_v18 }
0x178e   :  { %v3168_v20 = vpop.eup %3167 }
0x178f   :  { %v2325_v21 = vmul.f32 0.5, %v2323_v19  ;;  %v2324_v22 = vadd.f32 1.0, %v3168_v20 }
0x1791   :  { %v2326_v23 = vmul.f32 0.5, %v2324_v22  ;;  %v2327_v24 = vmul.f32 %v2325_v21, %v2305_v0 }
0x1793   :  { %v2328_v25 = vmul.f32 %v2326_v23, %v2308_v6  ;;  %v3111_v6 = vld [vmem:[%s3765_s7] sm:$0xff]   ;;  %s3173_s7 = scalar_lea.vmem %s2613_s2, 32 }
0x1794   :  { %p3174_p0 = scmp.ne.s32.totalorder %s2613_s2, %s3173_s7  ;;  %p3179_p2 = scmp.lt.s32.totalorder %s3173_s7, %s3173_s7 }
0x1795   :  { %v2329_v26 = vpack.c.bf16 %v2328_v25, %v2327_v24 }
0x1796   :  { %p3180_p3 = por %p3179_p2, %p3178_p1 }
0x1797   :  { %3025 = vmatmul.mubr.bf16.vlgmr.msra.gmra.mrb[20].mxu0 %v2329_v26 }
0x1798   :  { %p3181_p4 = pnand %p3180_p3, %p3174_p0 }
0x186a   :  { %v2416_v33 = vpop.f32.mrb[20].mxu0 }
0x186b   :  { %v2417_v34 = vadd.f32 %v2710_v28, %v2416_v33  ;;  %v3026_v35 = vpop.f32.mrb[21].mxu0 }
0x186c   :  { %v2419_v36 = vpop.f32.mrb[22].mxu0 }
0x186d   :  { %v2420_v9 = vadd.f32 %v2710_v28, %v2419_v36  ;;  %v3027_v13 = vpop.f32.mrb[23].mxu0  ;;  %v2423_v44 = vadd.f32 %v2417_v34, %v3670_v56 }
0x186f   :  { %v2425_v45 = vsel %vm162_vm11, %v2423_v44, 0.0  ;;  %v2424_v53 = vadd.f32 %v2420_v9, %v3672_v57 }
0x1870   :  { %2426 = vadd.xlane.f32.xlu0 %v2425_v45 }
0x1871   :  { %v2428_v52 = vsel %vm162_vm11, %v2424_v53, 0.0 }
0x1872   :  { %2429 = vadd.xlane.f32.xlu1 %v2428_v52 }
0x18fd   :  { %v2427_v38 = vpop.xlane.xlu0 %2426 }
0x18fe   :  { %v2431_v39 = vmul.f32 0.03125, %v2427_v38 }
0x18ff   :  { %v2430_v40 = vpop.xlane.xlu1 %2429 }
0x1900   :  { %v2433_v41 = vsub.f32 %v2423_v44, %v2431_v39  ;;  %v2432_v42 = vmul.f32 0.03125, %v2430_v40 }
0x1902   :  { %v2434_v43 = vsub.f32 %v2424_v53, %v2432_v42  ;;  %v2435_v46 = vmul.f32 %v2433_v41, %v2433_v41 }
0x1904   :  { %v2437_v47 = vsel %vm162_vm11, %v2435_v46, 0.0  ;;  %v2436_v48 = vmul.f32 %v2434_v43, %v2434_v43 }
0x1905   :  { %2438 = vadd.xlane.f32.xlu0 %v2437_v47 }
0x1906   :  { %v2440_v37 = vsel %vm162_vm11, %v2436_v48, 0.0 }
0x1907   :  { %2441 = vadd.xlane.f32.xlu1 %v2440_v37 }
0x1992   :  { %v2439_v51 = vpop.xlane.xlu0 %2438 }
0x1993   :  { %v2443_v55 = vmul.f32 0.03125, %v2439_v51 }
0x1994   :  { %v2442_v56 = vpop.xlane.xlu1 %2441 }
0x1995   :  { %v2445_v57 = vadd.f32 1e-12, %v2443_v55  ;;  %v2444_v58 = vmul.f32 0.03125, %v2442_v56 }
0x1997   :  { %3169 = vrsqrt.f32 %v2445_v57  ;;  %v2446_v32 = vadd.f32 1e-12, %v2444_v58 }
0x1999   :  { %3171 = vrsqrt.f32 %v2446_v32 }
0x19a1   :  { %v3170_v59 = vpop.eup %3169 }
0x19a2   :  { %v2449_v61 = vmul.f32 %v3170_v59, %v2433_v41 }
0x19a3   :  { %v3172_v62 = vpop.eup %3171 }
0x19a4   :  { %v2450_v31 = vmul.f32 %v3172_v62, %v2434_v43  ;;  %v2455_v29 = vmul.f32 %v2719_v60, %v2449_v61 }
0x19a6   :  { %v2456_v63 = vmul.f32 %v2719_v60, %v2450_v31  ;;  %v2461_v0 = vadd.f32 %v2720_v49, %v2455_v29 }
0x19a8   :  { %v2462_v1 = vadd.f32 %v2720_v49, %v2456_v63 }
0x19aa   :  { %v3072_v2 = vpack.c.bf16 %v2462_v1, %v2461_v0 }
0x19ac   :  { %3073 = vmatpush3.bf16.msra.mxu1 %v3072_v2 }
0x19ad   :  { %3035 = vmatprep.subr.bf16.mxu1 %v3198_v14 }
0x19af   :  { %3033 = vmatmul.mubr.msk.f32.vlgmr.msra.gmra.mrb[42].mxu1 %vm336_vm13, %v2465_v3 }
0x19b0   :  { %3036 = vmatpush3.bf16.msra.mxu1 %v3111_v6  ;;  %3039 = vmatprep.mubr.msk.bf16.mxu1 %vm3199_vm12, %v3198_v14 }
0x19b1   :  { %3037 = vmatprep.subr.bf16.mxu1 %v3198_v14 }
0x19b4   :  { %3038 = vmatpush3.bf16.msra.mxu1 %v3112_v27 }
0x1a82   :  { %v2535_v30 = vpop.f32.mrb[42].mxu1 }
0x1a83   :  { %v2539_v7 = vpack.c.bf16 %v2535_v30, %v2535_v30  ;;  %v3034_v8 = vpop.f32.mrb[43].mxu1 }
0x1a85   :  { %3040 = vmatmul.mubr.msk.bf16.vlgmr.msra.gmra.mrb[52].mxu1 %vm162_vm11, %v2539_v7 }
0x1b58   :  { %v2598_v11 = vpop.f32.mrb[52].mxu1 }
0x1b59   :  { %v2599_v4 = vadd.f32 %v2722_v10, %v2598_v11  ;;  %v3041_v14 = vpop.f32.mrb[53].mxu1 }
0x1b5a   :  { %v2601_v5 = vpop.f32.mrb[54].mxu1 }
0x1b5b   :  { %v3042_v12 = vpop.f32.mrb[55].mxu1  ;;  %2605 = vst.msk [vmem:[#allocation2] sm:$0x3] %vm2604_vm1, %v2599_v4 }
0x1b5c   :  { %3184 = shalt.err (!%p3181_p4)
}
0x1b5d   :  { %s3185_s3 = scalar_lea.hbm %s3766_s8, 32 }
0x1b5e   :  { %p3186_p5 = scmp.ne.s32.totalorder %s3766_s8, %s3185_s3  ;;  %p3189_p6 = scmp.lt.u32.totalorder %s3185_s3, %s3766_s8 }
0x1b60   :  { %p3191_p7 = pnand %p3189_p6, %p3186_p5 }
0x1b62   :  { %3194 = shalt.err (!%p3191_p7)
}
0x1b63   :  { %2615 = dma.vmem_to_hbm [thread:$0]  %s2613_s2, 32, %s3766_s8, [#allocation3]  }
0x1b64   :  { %3195 = dma.done.wait [#allocation3], 32  }
0x1b65   :  { %3196 = vsyncadd [#allocation3], 4294967264 }
0x1b66   :  { %2619 = vsyncpa [#allocation3], 1 }

</bundles_post_ra>
